<compile_context>
chip_gen: v7x
topology: tpu7x:2x2x1
jax: 0.10.0
libtpu: 0.0.40
codegen_flags: <defaults>
</compile_context>

<pallas_src>
import functools

import jax
import jax.numpy as jnp
from jax import lax
from jax.experimental import pallas as pl
from jax.experimental.pallas import tpu as pltpu


def _make_kernel(num_layers, T, B, I, H, K):
    H4 = 4 * H

    def kernel(x_ref, *args):
        # args layout:
        #   per layer l: w_ih_T (in_l, 4H) [i,f,g,o] (g cols pre-scaled by 2),
        #                w_hh_T (H, 4H)    (g cols pre-scaled by 2),
        #                b      (1, 4H)    (b_ih + b_hh, g cols pre-scaled by 2)
        #   then:        w_fc_T (H, K), b_fc (1, K)
        #   then:        out_ref (B, K)
        layer_refs = args[: 3 * num_layers]
        w_fc_ref = args[3 * num_layers]
        b_fc_ref = args[3 * num_layers + 1]
        out_ref = args[3 * num_layers + 2]

        # Layer input, flattened to (T*B, in_l). Layer 0 comes from x; deeper
        # layers come from the register-resident stacked hidden states.
        inp2d = x_ref[...].reshape(T * B, I)
        in_l = I
        h = None

        for l in range(num_layers):
            w_ih = layer_refs[3 * l][...]      # (in_l, 4H)
            w_hh = layer_refs[3 * l + 1][...]  # (H, 4H)
            b = layer_refs[3 * l + 2][...]     # (1, 4H)

            # Hoisted input projection: one (T*B, in_l) x (in_l, 4H) MXU matmul
            # instead of T tiny ones on the serial critical path.
            gx = (
                jnp.dot(inp2d, w_ih, preferred_element_type=jnp.float32) + b
            ).reshape(T, B, H4)

            h = jnp.zeros((B, H), jnp.float32)
            c = jnp.zeros((B, H), jnp.float32)
            last_layer = l == num_layers - 1
            hs = []

            # Fully unrolled recurrence over T (static, small): only the
            # hidden-state matmul, ONE sigmoid, one tanh(c) and a few VPU ops
            # remain per step.
            for t in range(T):
                z = gx[t] + jnp.dot(h, w_hh, preferred_element_type=jnp.float32)
                # Single full-width EUP pass over all 4 gates. g columns of z are
                # already 2*g_pre, so tanh(g_pre) == 2*sigmoid(2*g_pre) - 1.
                s = jax.nn.sigmoid(z)
                i_g = s[:, 0:H]
                f_g = s[:, H:2 * H]
                g_g = 2.0 * s[:, 2 * H:3 * H] - 1.0   # tanh via sigmoid identity (VPU)
                o_g = s[:, 3 * H:4 * H]
                c = f_g * c + i_g * g_g
                h = o_g * jnp.tanh(c)
                if not last_layer:
                    hs.append(h)

            if not last_layer:
                # Register-resident (T*B, H) slab for the next layer's projection.
                inp2d = jnp.concatenate(hs, axis=0)
                in_l = H

        # fc(out[:, -1, :]) == fc(h of last layer at last timestep)
        out_ref[...] = (
            jnp.dot(h, w_fc_ref[...], preferred_element_type=jnp.float32)
            + b_fc_ref[...]
        )

    return kernel


def prepare_params(params, *, hidden_size, num_layers):
    """One-time weight preparation (call once, outside the forward path).

    Scales the g-gate (columns 2H:3H, PyTorch order [i,f,g,o]) of W_ih, W_hh and the
    pre-summed bias by 2 so the kernel can use a single full-width sigmoid and the
    identity tanh(x) = 2*sigmoid(2x) - 1. Returns a flat tuple of arrays.
    """
    H = hidden_size
    scale = jnp.ones((4 * H,), jnp.float32).at[2 * H:3 * H].set(2.0)
    flat = []
    for l in range(num_layers):
        flat.append(params[f"w_ih_{l}"] * scale[None, :])   # (in_l, 4H)
        flat.append(params[f"w_hh_{l}"] * scale[None, :])   # (H, 4H)
        flat.append(params[f"b_{l}"] * scale[None, :])      # (1, 4H)
    flat.append(params["w_fc"])                              # (H, K)
    flat.append(params["b_fc"])                              # (1, K)
    return tuple(jax.device_put(w) for w in flat)


@functools.partial(
    jax.jit, static_argnames=("hidden_size", "num_layers", "num_keys")
)
def deeplog_forward(x, flat, *, hidden_size, num_layers, num_keys):
    """x: (B, T, I) float32. flat: output of prepare_params()."""
    B, T, I = x.shape
    H, K, L = hidden_size, num_keys, num_layers

    # Pad the batch to a full 8-sublane tile so every load/store is unmasked.
    Bp = ((B + 7) // 8) * 8
    x_tm = jnp.transpose(x, (1, 0, 2))          # (T, B, I) time-major
    if Bp != B:
        x_tm = jnp.pad(x_tm, ((0, 0), (0, Bp - B), (0, 0)))

    kernel = _make_kernel(L, T, Bp, I, H, K)
    n_inputs = 1 + len(flat)

    # Shapes are tiny (well under 100 KiB resident) -> no grid / VMEM tiling needed.
    out = pl.pallas_call(
        kernel,
        out_shape=jax.ShapeDtypeStruct((Bp, K), jnp.float32),
        in_specs=[pl.BlockSpec(memory_space=pltpu.MemorySpace.VMEM)] * n_inputs,
        out_specs=pl.BlockSpec(memory_space=pltpu.MemorySpace.VMEM),
    )(x_tm, *flat)
    return out[:B]


def init_params(key, input_size, hidden_size, num_layers, num_keys):
    """Deterministic PyTorch-style init (uniform +-1/sqrt(H)); weights stored
    transposed, gate order kept as PyTorch [i, f, g, o]."""
    H = hidden_size
    bound = 1.0 / jnp.sqrt(jnp.float32(H))
    params = {}
    for l in range(num_layers):
        in_l = input_size if l == 0 else hidden_size
        key, k1, k2, k3, k4 = jax.random.split(key, 5)
        w_ih = jax.random.uniform(k1, (4 * H, in_l), jnp.float32, -bound, bound)
        w_hh = jax.random.uniform(k2, (4 * H, H), jnp.float32, -bound, bound)
        b_ih = jax.random.uniform(k3, (4 * H,), jnp.float32, -bound, bound)
        b_hh = jax.random.uniform(k4, (4 * H,), jnp.float32, -bound, bound)
        params[f"w_ih_{l}"] = w_ih.T                       # (in_l, 4H)
        params[f"w_hh_{l}"] = w_hh.T                       # (H, 4H)
        params[f"b_{l}"] = (b_ih + b_hh)[None, :]          # (1, 4H)
    key, k5, k6 = jax.random.split(key, 3)
    fb = 1.0 / jnp.sqrt(jnp.float32(H))
    w_fc = jax.random.uniform(k5, (num_keys, H), jnp.float32, -fb, fb)
    b_fc = jax.random.uniform(k6, (num_keys,), jnp.float32, -fb, fb)
    params["w_fc"] = w_fc.T                                # (H, K)
    params["b_fc"] = b_fc[None, :]                         # (1, K)
    return params


def deeplog_reference(x, params, *, hidden_size, num_layers, num_keys):
    """Pure-JAX reference (PyTorch gate order, unscaled weights) for correctness."""
    B, T, I = x.shape
    H = hidden_size
    inp = x
    h_last = None
    for l in range(num_layers):
        w_ih = params[f"w_ih_{l}"]
        w_hh = params[f"w_hh_{l}"]
        b = params[f"b_{l}"]

        def step(carry, x_t):
            h, c = carry
            z = x_t @ w_ih + h @ w_hh + b
            i_g = jax.nn.sigmoid(z[:, 0:H])
            f_g = jax.nn.sigmoid(z[:, H:2 * H])
            g_g = jnp.tanh(z[:, 2 * H:3 * H])
            o_g = jax.nn.sigmoid(z[:, 3 * H:4 * H])
            c_new = f_g * c + i_g * g_g
            h_new = o_g * jnp.tanh(c_new)
            return (h_new, c_new), h_new

        h0 = jnp.zeros((B, H), jnp.float32)
        c0 = jnp.zeros((B, H), jnp.float32)
        (h_last, _), hs = lax.scan(step, (h0, c0), jnp.transpose(inp, (1, 0, 2)))
        inp = jnp.transpose(hs, (1, 0, 2))
    return h_last @ params["w_fc"] + params["b_fc"]


if __name__ == "__main__":
    # Small DeepLog-style config: input_size=8, hidden_size=32, num_layers=2, num_keys=16
    input_size, hidden_size, num_layers, num_keys = 8, 32, 2, 16
    batch, seq = 4, 8

    key = jax.random.PRNGKey(0)
    key, kx = jax.random.split(key)
    x = jax.random.normal(kx, (batch, seq, input_size), jnp.float32)

    params = init_params(key, input_size, hidden_size, num_layers, num_keys)

    # One-time, cached weight preparation (hoisted out of the forward path).
    flat = prepare_params(params, hidden_size=hidden_size, num_layers=num_layers)

    out = jax.block_until_ready(
        deeplog_forward(
            x, flat,
            hidden_size=hidden_size, num_layers=num_layers, num_keys=num_keys,
        )
    )

    ref = deeplog_reference(
        x, params, hidden_size=hidden_size, num_layers=num_layers, num_keys=num_keys
    )
    assert out.shape == (batch, num_keys)
    assert jnp.allclose(out, ref, atol=5e-4, rtol=5e-4), (
        jnp.max(jnp.abs(out - ref))
    )

    print("KERNEL_OK")
</pallas_src>

<mosaic_0001>
module attributes {stable_mosaic.version = 11 : i64} {
  func.func @kernel(%arg0: memref<8x8x8xf32, #tpu.memory_space<vmem>>, %arg1: memref<8x128xf32, #tpu.memory_space<vmem>>, %arg2: memref<32x128xf32, #tpu.memory_space<vmem>>, %arg3: memref<1x128xf32, #tpu.memory_space<vmem>>, %arg4: memref<32x128xf32, #tpu.memory_space<vmem>>, %arg5: memref<32x128xf32, #tpu.memory_space<vmem>>, %arg6: memref<1x128xf32, #tpu.memory_space<vmem>>, %arg7: memref<32x16xf32, #tpu.memory_space<vmem>>, %arg8: memref<1x16xf32, #tpu.memory_space<vmem>>, %arg9: memref<8x16xf32, #tpu.memory_space<vmem>>) attributes {dimension_semantics = [], scalar_prefetch = 0 : i64, scratch_operands = 0 : i64, tpu.core_type = #tpu.core_type<tc>} {
    %c0 = arith.constant 0 : index
    %c0_0 = arith.constant 0 : index
    %c0_1 = arith.constant 0 : index
    %0 = vector.load %arg0[%c0, %c0_0, %c0_1] : memref<8x8x8xf32, #tpu.memory_space<vmem>>, vector<8x8x8xf32>
    %1 = vector.shape_cast %0 : vector<8x8x8xf32> to vector<64x8xf32>
    %c0_2 = arith.constant 0 : index
    %c0_3 = arith.constant 0 : index
    %2 = vector.load %arg1[%c0_2, %c0_3] : memref<8x128xf32, #tpu.memory_space<vmem>>, vector<8x128xf32>
    %c0_4 = arith.constant 0 : index
    %c0_5 = arith.constant 0 : index
    %3 = vector.load %arg2[%c0_4, %c0_5] : memref<32x128xf32, #tpu.memory_space<vmem>>, vector<32x128xf32>
    %c0_6 = arith.constant 0 : index
    %c0_7 = arith.constant 0 : index
    %4 = vector.load %arg3[%c0_6, %c0_7] : memref<1x128xf32, #tpu.memory_space<vmem>>, vector<1x128xf32>
    %cst = arith.constant dense<0.000000e+00> : vector<64x128xf32>
    %5 = tpu.matmul %1, %2, %cst {dimension_numbers = #tpu.dot_dimension_numbers<[1], [0], [0], [1], [0, 0, 1, 1], [], []>} : vector<64x8xf32>, vector<8x128xf32>, vector<64x128xf32> -> vector<64x128xf32>
    %6 = vector.broadcast %4 : vector<1x128xf32> to vector<64x128xf32>
    %7 = arith.addf %5, %6 : vector<64x128xf32>
    %8 = vector.shape_cast %7 : vector<64x128xf32> to vector<8x8x128xf32>
    %cst_8 = arith.constant 0.000000e+00 : f32
    %9 = vector.broadcast %cst_8 : f32 to vector<8x32xf32>
    %cst_9 = arith.constant 0.000000e+00 : f32
    %10 = vector.broadcast %cst_9 : f32 to vector<8x32xf32>
    %11 = vector.extract_strided_slice %8 {offsets = [0, 0, 0], sizes = [1, 8, 128], strides = [1, 1, 1]} : vector<8x8x128xf32> to vector<1x8x128xf32>
    %12 = vector.shape_cast %11 : vector<1x8x128xf32> to vector<8x128xf32>
    %cst_10 = arith.constant dense<0.000000e+00> : vector<8x128xf32>
    %13 = tpu.matmul %9, %3, %cst_10 {dimension_numbers = #tpu.dot_dimension_numbers<[1], [0], [0], [1], [0, 0, 1, 1], [], []>} : vector<8x32xf32>, vector<32x128xf32>, vector<8x128xf32> -> vector<8x128xf32>
    %14 = arith.addf %12, %13 : vector<8x128xf32>
    %15 = arith.negf %14 : vector<8x128xf32>
    %16 = math.exp %15 : vector<8x128xf32>
    %cst_11 = arith.constant 1.000000e+00 : f32
    %17 = vector.broadcast %cst_11 : f32 to vector<8x128xf32>
    %18 = arith.addf %17, %16 : vector<8x128xf32>
    %19 = arith.divf %17, %18 : vector<8x128xf32>
    %20 = vector.extract_strided_slice %19 {offsets = [0, 0], sizes = [8, 32], strides = [1, 1]} : vector<8x128xf32> to vector<8x32xf32>
    %21 = vector.extract_strided_slice %19 {offsets = [0, 32], sizes = [8, 32], strides = [1, 1]} : vector<8x128xf32> to vector<8x32xf32>
    %22 = vector.extract_strided_slice %19 {offsets = [0, 64], sizes = [8, 32], strides = [1, 1]} : vector<8x128xf32> to vector<8x32xf32>
    %cst_12 = arith.constant 2.000000e+00 : f32
    %23 = vector.broadcast %cst_12 : f32 to vector<8x32xf32>
    %24 = arith.mulf %23, %22 : vector<8x32xf32>
    %cst_13 = arith.constant 1.000000e+00 : f32
    %25 = vector.broadcast %cst_13 : f32 to vector<8x32xf32>
    %26 = arith.subf %24, %25 : vector<8x32xf32>
    %27 = vector.extract_strided_slice %19 {offsets = [0, 96], sizes = [8, 32], strides = [1, 1]} : vector<8x128xf32> to vector<8x32xf32>
    %28 = arith.mulf %21, %10 : vector<8x32xf32>
    %29 = arith.mulf %20, %26 : vector<8x32xf32>
    %30 = arith.addf %28, %29 : vector<8x32xf32>
    %31 = math.tanh %30 : vector<8x32xf32>
    %32 = arith.mulf %27, %31 : vector<8x32xf32>
    %33 = vector.extract_strided_slice %8 {offsets = [1, 0, 0], sizes = [1, 8, 128], strides = [1, 1, 1]} : vector<8x8x128xf32> to vector<1x8x128xf32>
    %34 = vector.shape_cast %33 : vector<1x8x128xf32> to vector<8x128xf32>
    %cst_14 = arith.constant dense<0.000000e+00> : vector<8x128xf32>
    %35 = tpu.matmul %32, %3, %cst_14 {dimension_numbers = #tpu.dot_dimension_numbers<[1], [0], [0], [1], [0, 0, 1, 1], [], []>} : vector<8x32xf32>, vector<32x128xf32>, vector<8x128xf32> -> vector<8x128xf32>
    %36 = arith.addf %34, %35 : vector<8x128xf32>
    %37 = arith.negf %36 : vector<8x128xf32>
    %38 = math.exp %37 : vector<8x128xf32>
    %cst_15 = arith.constant 1.000000e+00 : f32
    %39 = vector.broadcast %cst_15 : f32 to vector<8x128xf32>
    %40 = arith.addf %39, %38 : vector<8x128xf32>
    %41 = arith.divf %39, %40 : vector<8x128xf32>
    %42 = vector.extract_strided_slice %41 {offsets = [0, 0], sizes = [8, 32], strides = [1, 1]} : vector<8x128xf32> to vector<8x32xf32>
    %43 = vector.extract_strided_slice %41 {offsets = [0, 32], sizes = [8, 32], strides = [1, 1]} : vector<8x128xf32> to vector<8x32xf32>
    %44 = vector.extract_strided_slice %41 {offsets = [0, 64], sizes = [8, 32], strides = [1, 1]} : vector<8x128xf32> to vector<8x32xf32>
    %cst_16 = arith.constant 2.000000e+00 : f32
    %45 = vector.broadcast %cst_16 : f32 to vector<8x32xf32>
    %46 = arith.mulf %45, %44 : vector<8x32xf32>
    %cst_17 = arith.constant 1.000000e+00 : f32
    %47 = vector.broadcast %cst_17 : f32 to vector<8x32xf32>
    %48 = arith.subf %46, %47 : vector<8x32xf32>
    %49 = vector.extract_strided_slice %41 {offsets = [0, 96], sizes = [8, 32], strides = [1, 1]} : vector<8x128xf32> to vector<8x32xf32>
    %50 = arith.mulf %43, %30 : vector<8x32xf32>
    %51 = arith.mulf %42, %48 : vector<8x32xf32>
    %52 = arith.addf %50, %51 : vector<8x32xf32>
    %53 = math.tanh %52 : vector<8x32xf32>
    %54 = arith.mulf %49, %53 : vector<8x32xf32>
    %55 = vector.extract_strided_slice %8 {offsets = [2, 0, 0], sizes = [1, 8, 128], strides = [1, 1, 1]} : vector<8x8x128xf32> to vector<1x8x128xf32>
    %56 = vector.shape_cast %55 : vector<1x8x128xf32> to vector<8x128xf32>
    %cst_18 = arith.constant dense<0.000000e+00> : vector<8x128xf32>
    %57 = tpu.matmul %54, %3, %cst_18 {dimension_numbers = #tpu.dot_dimension_numbers<[1], [0], [0], [1], [0, 0, 1, 1], [], []>} : vector<8x32xf32>, vector<32x128xf32>, vector<8x128xf32> -> vector<8x128xf32>
    %58 = arith.addf %56, %57 : vector<8x128xf32>
    %59 = arith.negf %58 : vector<8x128xf32>
    %60 = math.exp %59 : vector<8x128xf32>
    %cst_19 = arith.constant 1.000000e+00 : f32
    %61 = vector.broadcast %cst_19 : f32 to vector<8x128xf32>
    %62 = arith.addf %61, %60 : vector<8x128xf32>
    %63 = arith.divf %61, %62 : vector<8x128xf32>
    %64 = vector.extract_strided_slice %63 {offsets = [0, 0], sizes = [8, 32], strides = [1, 1]} : vector<8x128xf32> to vector<8x32xf32>
    %65 = vector.extract_strided_slice %63 {offsets = [0, 32], sizes = [8, 32], strides = [1, 1]} : vector<8x128xf32> to vector<8x32xf32>
    %66 = vector.extract_strided_slice %63 {offsets = [0, 64], sizes = [8, 32], strides = [1, 1]} : vector<8x128xf32> to vector<8x32xf32>
    %cst_20 = arith.constant 2.000000e+00 : f32
    %67 = vector.broadcast %cst_20 : f32 to vector<8x32xf32>
    %68 = arith.mulf %67, %66 : vector<8x32xf32>
    %cst_21 = arith.constant 1.000000e+00 : f32
    %69 = vector.broadcast %cst_21 : f32 to vector<8x32xf32>
    %70 = arith.subf %68, %69 : vector<8x32xf32>
    %71 = vector.extract_strided_slice %63 {offsets = [0, 96], sizes = [8, 32], strides = [1, 1]} : vector<8x128xf32> to vector<8x32xf32>
    %72 = arith.mulf %65, %52 : vector<8x32xf32>
    %73 = arith.mulf %64, %70 : vector<8x32xf32>
    %74 = arith.addf %72, %73 : vector<8x32xf32>
    %75 = math.tanh %74 : vector<8x32xf32>
    %76 = arith.mulf %71, %75 : vector<8x32xf32>
    %77 = vector.extract_strided_slice %8 {offsets = [3, 0, 0], sizes = [1, 8, 128], strides = [1, 1, 1]} : vector<8x8x128xf32> to vector<1x8x128xf32>
    %78 = vector.shape_cast %77 : vector<1x8x128xf32> to vector<8x128xf32>
    %cst_22 = arith.constant dense<0.000000e+00> : vector<8x128xf32>
    %79 = tpu.matmul %76, %3, %cst_22 {dimension_numbers = #tpu.dot_dimension_numbers<[1], [0], [0], [1], [0, 0, 1, 1], [], []>} : vector<8x32xf32>, vector<32x128xf32>, vector<8x128xf32> -> vector<8x128xf32>
    %80 = arith.addf %78, %79 : vector<8x128xf32>
    %81 = arith.negf %80 : vector<8x128xf32>
    %82 = math.exp %81 : vector<8x128xf32>
    %cst_23 = arith.constant 1.000000e+00 : f32
    %83 = vector.broadcast %cst_23 : f32 to vector<8x128xf32>
    %84 = arith.addf %83, %82 : vector<8x128xf32>
    %85 = arith.divf %83, %84 : vector<8x128xf32>
    %86 = vector.extract_strided_slice %85 {offsets = [0, 0], sizes = [8, 32], strides = [1, 1]} : vector<8x128xf32> to vector<8x32xf32>
    %87 = vector.extract_strided_slice %85 {offsets = [0, 32], sizes = [8, 32], strides = [1, 1]} : vector<8x128xf32> to vector<8x32xf32>
    %88 = vector.extract_strided_slice %85 {offsets = [0, 64], sizes = [8, 32], strides = [1, 1]} : vector<8x128xf32> to vector<8x32xf32>
    %cst_24 = arith.constant 2.000000e+00 : f32
    %89 = vector.broadcast %cst_24 : f32 to vector<8x32xf32>
    %90 = arith.mulf %89, %88 : vector<8x32xf32>
    %cst_25 = arith.constant 1.000000e+00 : f32
    %91 = vector.broadcast %cst_25 : f32 to vector<8x32xf32>
    %92 = arith.subf %90, %91 : vector<8x32xf32>
    %93 = vector.extract_strided_slice %85 {offsets = [0, 96], sizes = [8, 32], strides = [1, 1]} : vector<8x128xf32> to vector<8x32xf32>
    %94 = arith.mulf %87, %74 : vector<8x32xf32>
    %95 = arith.mulf %86, %92 : vector<8x32xf32>
    %96 = arith.addf %94, %95 : vector<8x32xf32>
    %97 = math.tanh %96 : vector<8x32xf32>
    %98 = arith.mulf %93, %97 : vector<8x32xf32>
    %99 = vector.extract_strided_slice %8 {offsets = [4, 0, 0], sizes = [1, 8, 128], strides = [1, 1, 1]} : vector<8x8x128xf32> to vector<1x8x128xf32>
    %100 = vector.shape_cast %99 : vector<1x8x128xf32> to vector<8x128xf32>
    %cst_26 = arith.constant dense<0.000000e+00> : vector<8x128xf32>
    %101 = tpu.matmul %98, %3, %cst_26 {dimension_numbers = #tpu.dot_dimension_numbers<[1], [0], [0], [1], [0, 0, 1, 1], [], []>} : vector<8x32xf32>, vector<32x128xf32>, vector<8x128xf32> -> vector<8x128xf32>
    %102 = arith.addf %100, %101 : vector<8x128xf32>
    %103 = arith.negf %102 : vector<8x128xf32>
    %104 = math.exp %103 : vector<8x128xf32>
    %cst_27 = arith.constant 1.000000e+00 : f32
    %105 = vector.broadcast %cst_27 : f32 to vector<8x128xf32>
    %106 = arith.addf %105, %104 : vector<8x128xf32>
    %107 = arith.divf %105, %106 : vector<8x128xf32>
    %108 = vector.extract_strided_slice %107 {offsets = [0, 0], sizes = [8, 32], strides = [1, 1]} : vector<8x128xf32> to vector<8x32xf32>
    %109 = vector.extract_strided_slice %107 {offsets = [0, 32], sizes = [8, 32], strides = [1, 1]} : vector<8x128xf32> to vector<8x32xf32>
    %110 = vector.extract_strided_slice %107 {offsets = [0, 64], sizes = [8, 32], strides = [1, 1]} : vector<8x128xf32> to vector<8x32xf32>
    %cst_28 = arith.constant 2.000000e+00 : f32
    %111 = vector.broadcast %cst_28 : f32 to vector<8x32xf32>
    %112 = arith.mulf %111, %110 : vector<8x32xf32>
    %cst_29 = arith.constant 1.000000e+00 : f32
    %113 = vector.broadcast %cst_29 : f32 to vector<8x32xf32>
    %114 = arith.subf %112, %113 : vector<8x32xf32>
    %115 = vector.extract_strided_slice %107 {offsets = [0, 96], sizes = [8, 32], strides = [1, 1]} : vector<8x128xf32> to vector<8x32xf32>
    %116 = arith.mulf %109, %96 : vector<8x32xf32>
    %117 = arith.mulf %108, %114 : vector<8x32xf32>
    %118 = arith.addf %116, %117 : vector<8x32xf32>
    %119 = math.tanh %118 : vector<8x32xf32>
    %120 = arith.mulf %115, %119 : vector<8x32xf32>
    %121 = vector.extract_strided_slice %8 {offsets = [5, 0, 0], sizes = [1, 8, 128], strides = [1, 1, 1]} : vector<8x8x128xf32> to vector<1x8x128xf32>
    %122 = vector.shape_cast %121 : vector<1x8x128xf32> to vector<8x128xf32>
    %cst_30 = arith.constant dense<0.000000e+00> : vector<8x128xf32>
    %123 = tpu.matmul %120, %3, %cst_30 {dimension_numbers = #tpu.dot_dimension_numbers<[1], [0], [0], [1], [0, 0, 1, 1], [], []>} : vector<8x32xf32>, vector<32x128xf32>, vector<8x128xf32> -> vector<8x128xf32>
    %124 = arith.addf %122, %123 : vector<8x128xf32>
    %125 = arith.negf %124 : vector<8x128xf32>
    %126 = math.exp %125 : vector<8x128xf32>
    %cst_31 = arith.constant 1.000000e+00 : f32
    %127 = vector.broadcast %cst_31 : f32 to vector<8x128xf32>
    %128 = arith.addf %127, %126 : vector<8x128xf32>
    %129 = arith.divf %127, %128 : vector<8x128xf32>
    %130 = vector.extract_strided_slice %129 {offsets = [0, 0], sizes = [8, 32], strides = [1, 1]} : vector<8x128xf32> to vector<8x32xf32>
    %131 = vector.extract_strided_slice %129 {offsets = [0, 32], sizes = [8, 32], strides = [1, 1]} : vector<8x128xf32> to vector<8x32xf32>
    %132 = vector.extract_strided_slice %129 {offsets = [0, 64], sizes = [8, 32], strides = [1, 1]} : vector<8x128xf32> to vector<8x32xf32>
    %cst_32 = arith.constant 2.000000e+00 : f32
    %133 = vector.broadcast %cst_32 : f32 to vector<8x32xf32>
    %134 = arith.mulf %133, %132 : vector<8x32xf32>
    %cst_33 = arith.constant 1.000000e+00 : f32
    %135 = vector.broadcast %cst_33 : f32 to vector<8x32xf32>
    %136 = arith.subf %134, %135 : vector<8x32xf32>
    %137 = vector.extract_strided_slice %129 {offsets = [0, 96], sizes = [8, 32], strides = [1, 1]} : vector<8x128xf32> to vector<8x32xf32>
    %138 = arith.mulf %131, %118 : vector<8x32xf32>
    %139 = arith.mulf %130, %136 : vector<8x32xf32>
    %140 = arith.addf %138, %139 : vector<8x32xf32>
    %141 = math.tanh %140 : vector<8x32xf32>
    %142 = arith.mulf %137, %141 : vector<8x32xf32>
    %143 = vector.extract_strided_slice %8 {offsets = [6, 0, 0], sizes = [1, 8, 128], strides = [1, 1, 1]} : vector<8x8x128xf32> to vector<1x8x128xf32>
    %144 = vector.shape_cast %143 : vector<1x8x128xf32> to vector<8x128xf32>
    %cst_34 = arith.constant dense<0.000000e+00> : vector<8x128xf32>
    %145 = tpu.matmul %142, %3, %cst_34 {dimension_numbers = #tpu.dot_dimension_numbers<[1], [0], [0], [1], [0, 0, 1, 1], [], []>} : vector<8x32xf32>, vector<32x128xf32>, vector<8x128xf32> -> vector<8x128xf32>
    %146 = arith.addf %144, %145 : vector<8x128xf32>
    %147 = arith.negf %146 : vector<8x128xf32>
    %148 = math.exp %147 : vector<8x128xf32>
    %cst_35 = arith.constant 1.000000e+00 : f32
    %149 = vector.broadcast %cst_35 : f32 to vector<8x128xf32>
    %150 = arith.addf %149, %148 : vector<8x128xf32>
    %151 = arith.divf %149, %150 : vector<8x128xf32>
    %152 = vector.extract_strided_slice %151 {offsets = [0, 0], sizes = [8, 32], strides = [1, 1]} : vector<8x128xf32> to vector<8x32xf32>
    %153 = vector.extract_strided_slice %151 {offsets = [0, 32], sizes = [8, 32], strides = [1, 1]} : vector<8x128xf32> to vector<8x32xf32>
    %154 = vector.extract_strided_slice %151 {offsets = [0, 64], sizes = [8, 32], strides = [1, 1]} : vector<8x128xf32> to vector<8x32xf32>
    %cst_36 = arith.constant 2.000000e+00 : f32
    %155 = vector.broadcast %cst_36 : f32 to vector<8x32xf32>
    %156 = arith.mulf %155, %154 : vector<8x32xf32>
    %cst_37 = arith.constant 1.000000e+00 : f32
    %157 = vector.broadcast %cst_37 : f32 to vector<8x32xf32>
    %158 = arith.subf %156, %157 : vector<8x32xf32>
    %159 = vector.extract_strided_slice %151 {offsets = [0, 96], sizes = [8, 32], strides = [1, 1]} : vector<8x128xf32> to vector<8x32xf32>
    %160 = arith.mulf %153, %140 : vector<8x32xf32>
    %161 = arith.mulf %152, %158 : vector<8x32xf32>
    %162 = arith.addf %160, %161 : vector<8x32xf32>
    %163 = math.tanh %162 : vector<8x32xf32>
    %164 = arith.mulf %159, %163 : vector<8x32xf32>
    %165 = vector.extract_strided_slice %8 {offsets = [7, 0, 0], sizes = [1, 8, 128], strides = [1, 1, 1]} : vector<8x8x128xf32> to vector<1x8x128xf32>
    %166 = vector.shape_cast %165 : vector<1x8x128xf32> to vector<8x128xf32>
    %cst_38 = arith.constant dense<0.000000e+00> : vector<8x128xf32>
    %167 = tpu.matmul %164, %3, %cst_38 {dimension_numbers = #tpu.dot_dimension_numbers<[1], [0], [0], [1], [0, 0, 1, 1], [], []>} : vector<8x32xf32>, vector<32x128xf32>, vector<8x128xf32> -> vector<8x128xf32>
    %168 = arith.addf %166, %167 : vector<8x128xf32>
    %169 = arith.negf %168 : vector<8x128xf32>
    %170 = math.exp %169 : vector<8x128xf32>
    %cst_39 = arith.constant 1.000000e+00 : f32
    %171 = vector.broadcast %cst_39 : f32 to vector<8x128xf32>
    %172 = arith.addf %171, %170 : vector<8x128xf32>
    %173 = arith.divf %171, %172 : vector<8x128xf32>
    %174 = vector.extract_strided_slice %173 {offsets = [0, 0], sizes = [8, 32], strides = [1, 1]} : vector<8x128xf32> to vector<8x32xf32>
    %175 = vector.extract_strided_slice %173 {offsets = [0, 32], sizes = [8, 32], strides = [1, 1]} : vector<8x128xf32> to vector<8x32xf32>
    %176 = vector.extract_strided_slice %173 {offsets = [0, 64], sizes = [8, 32], strides = [1, 1]} : vector<8x128xf32> to vector<8x32xf32>
    %cst_40 = arith.constant 2.000000e+00 : f32
    %177 = vector.broadcast %cst_40 : f32 to vector<8x32xf32>
    %178 = arith.mulf %177, %176 : vector<8x32xf32>
    %cst_41 = arith.constant 1.000000e+00 : f32
    %179 = vector.broadcast %cst_41 : f32 to vector<8x32xf32>
    %180 = arith.subf %178, %179 : vector<8x32xf32>
    %181 = vector.extract_strided_slice %173 {offsets = [0, 96], sizes = [8, 32], strides = [1, 1]} : vector<8x128xf32> to vector<8x32xf32>
    %182 = arith.mulf %175, %162 : vector<8x32xf32>
    %183 = arith.mulf %174, %180 : vector<8x32xf32>
    %184 = arith.addf %182, %183 : vector<8x32xf32>
    %185 = math.tanh %184 : vector<8x32xf32>
    %186 = arith.mulf %181, %185 : vector<8x32xf32>
    %187 = tpu.concatenate %32, %54, %76, %98, %120, %142, %164, %186 in 0 : vector<8x32xf32>, vector<8x32xf32>, vector<8x32xf32>, vector<8x32xf32>, vector<8x32xf32>, vector<8x32xf32>, vector<8x32xf32>, vector<8x32xf32> -> vector<64x32xf32>
    %c0_42 = arith.constant 0 : index
    %c0_43 = arith.constant 0 : index
    %188 = vector.load %arg4[%c0_42, %c0_43] : memref<32x128xf32, #tpu.memory_space<vmem>>, vector<32x128xf32>
    %c0_44 = arith.constant 0 : index
    %c0_45 = arith.constant 0 : index
    %189 = vector.load %arg5[%c0_44, %c0_45] : memref<32x128xf32, #tpu.memory_space<vmem>>, vector<32x128xf32>
    %c0_46 = arith.constant 0 : index
    %c0_47 = arith.constant 0 : index
    %190 = vector.load %arg6[%c0_46, %c0_47] : memref<1x128xf32, #tpu.memory_space<vmem>>, vector<1x128xf32>
    %cst_48 = arith.constant dense<0.000000e+00> : vector<64x128xf32>
    %191 = tpu.matmul %187, %188, %cst_48 {dimension_numbers = #tpu.dot_dimension_numbers<[1], [0], [0], [1], [0, 0, 1, 1], [], []>} : vector<64x32xf32>, vector<32x128xf32>, vector<64x128xf32> -> vector<64x128xf32>
    %192 = vector.broadcast %190 : vector<1x128xf32> to vector<64x128xf32>
    %193 = arith.addf %191, %192 : vector<64x128xf32>
    %194 = vector.shape_cast %193 : vector<64x128xf32> to vector<8x8x128xf32>
    %cst_49 = arith.constant 0.000000e+00 : f32
    %195 = vector.broadcast %cst_49 : f32 to vector<8x32xf32>
    %cst_50 = arith.constant 0.000000e+00 : f32
    %196 = vector.broadcast %cst_50 : f32 to vector<8x32xf32>
    %197 = vector.extract_strided_slice %194 {offsets = [0, 0, 0], sizes = [1, 8, 128], strides = [1, 1, 1]} : vector<8x8x128xf32> to vector<1x8x128xf32>
    %198 = vector.shape_cast %197 : vector<1x8x128xf32> to vector<8x128xf32>
    %cst_51 = arith.constant dense<0.000000e+00> : vector<8x128xf32>
    %199 = tpu.matmul %195, %189, %cst_51 {dimension_numbers = #tpu.dot_dimension_numbers<[1], [0], [0], [1], [0, 0, 1, 1], [], []>} : vector<8x32xf32>, vector<32x128xf32>, vector<8x128xf32> -> vector<8x128xf32>
    %200 = arith.addf %198, %199 : vector<8x128xf32>
    %201 = arith.negf %200 : vector<8x128xf32>
    %202 = math.exp %201 : vector<8x128xf32>
    %cst_52 = arith.constant 1.000000e+00 : f32
    %203 = vector.broadcast %cst_52 : f32 to vector<8x128xf32>
    %204 = arith.addf %203, %202 : vector<8x128xf32>
    %205 = arith.divf %203, %204 : vector<8x128xf32>
    %206 = vector.extract_strided_slice %205 {offsets = [0, 0], sizes = [8, 32], strides = [1, 1]} : vector<8x128xf32> to vector<8x32xf32>
    %207 = vector.extract_strided_slice %205 {offsets = [0, 32], sizes = [8, 32], strides = [1, 1]} : vector<8x128xf32> to vector<8x32xf32>
    %208 = vector.extract_strided_slice %205 {offsets = [0, 64], sizes = [8, 32], strides = [1, 1]} : vector<8x128xf32> to vector<8x32xf32>
    %cst_53 = arith.constant 2.000000e+00 : f32
    %209 = vector.broadcast %cst_53 : f32 to vector<8x32xf32>
    %210 = arith.mulf %209, %208 : vector<8x32xf32>
    %cst_54 = arith.constant 1.000000e+00 : f32
    %211 = vector.broadcast %cst_54 : f32 to vector<8x32xf32>
    %212 = arith.subf %210, %211 : vector<8x32xf32>
    %213 = vector.extract_strided_slice %205 {offsets = [0, 96], sizes = [8, 32], strides = [1, 1]} : vector<8x128xf32> to vector<8x32xf32>
    %214 = arith.mulf %207, %196 : vector<8x32xf32>
    %215 = arith.mulf %206, %212 : vector<8x32xf32>
    %216 = arith.addf %214, %215 : vector<8x32xf32>
    %217 = math.tanh %216 : vector<8x32xf32>
    %218 = arith.mulf %213, %217 : vector<8x32xf32>
    %219 = vector.extract_strided_slice %194 {offsets = [1, 0, 0], sizes = [1, 8, 128], strides = [1, 1, 1]} : vector<8x8x128xf32> to vector<1x8x128xf32>
    %220 = vector.shape_cast %219 : vector<1x8x128xf32> to vector<8x128xf32>
    %cst_55 = arith.constant dense<0.000000e+00> : vector<8x128xf32>
    %221 = tpu.matmul %218, %189, %cst_55 {dimension_numbers = #tpu.dot_dimension_numbers<[1], [0], [0], [1], [0, 0, 1, 1], [], []>} : vector<8x32xf32>, vector<32x128xf32>, vector<8x128xf32> -> vector<8x128xf32>
    %222 = arith.addf %220, %221 : vector<8x128xf32>
    %223 = arith.negf %222 : vector<8x128xf32>
    %224 = math.exp %223 : vector<8x128xf32>
    %cst_56 = arith.constant 1.000000e+00 : f32
    %225 = vector.broadcast %cst_56 : f32 to vector<8x128xf32>
    %226 = arith.addf %225, %224 : vector<8x128xf32>
    %227 = arith.divf %225, %226 : vector<8x128xf32>
    %228 = vector.extract_strided_slice %227 {offsets = [0, 0], sizes = [8, 32], strides = [1, 1]} : vector<8x128xf32> to vector<8x32xf32>
    %229 = vector.extract_strided_slice %227 {offsets = [0, 32], sizes = [8, 32], strides = [1, 1]} : vector<8x128xf32> to vector<8x32xf32>
    %230 = vector.extract_strided_slice %227 {offsets = [0, 64], sizes = [8, 32], strides = [1, 1]} : vector<8x128xf32> to vector<8x32xf32>
    %cst_57 = arith.constant 2.000000e+00 : f32
    %231 = vector.broadcast %cst_57 : f32 to vector<8x32xf32>
    %232 = arith.mulf %231, %230 : vector<8x32xf32>
    %cst_58 = arith.constant 1.000000e+00 : f32
    %233 = vector.broadcast %cst_58 : f32 to vector<8x32xf32>
    %234 = arith.subf %232, %233 : vector<8x32xf32>
    %235 = vector.extract_strided_slice %227 {offsets = [0, 96], sizes = [8, 32], strides = [1, 1]} : vector<8x128xf32> to vector<8x32xf32>
    %236 = arith.mulf %229, %216 : vector<8x32xf32>
    %237 = arith.mulf %228, %234 : vector<8x32xf32>
    %238 = arith.addf %236, %237 : vector<8x32xf32>
    %239 = math.tanh %238 : vector<8x32xf32>
    %240 = arith.mulf %235, %239 : vector<8x32xf32>
    %241 = vector.extract_strided_slice %194 {offsets = [2, 0, 0], sizes = [1, 8, 128], strides = [1, 1, 1]} : vector<8x8x128xf32> to vector<1x8x128xf32>
    %242 = vector.shape_cast %241 : vector<1x8x128xf32> to vector<8x128xf32>
    %cst_59 = arith.constant dense<0.000000e+00> : vector<8x128xf32>
    %243 = tpu.matmul %240, %189, %cst_59 {dimension_numbers = #tpu.dot_dimension_numbers<[1], [0], [0], [1], [0, 0, 1, 1], [], []>} : vector<8x32xf32>, vector<32x128xf32>, vector<8x128xf32> -> vector<8x128xf32>
    %244 = arith.addf %242, %243 : vector<8x128xf32>
    %245 = arith.negf %244 : vector<8x128xf32>
    %246 = math.exp %245 : vector<8x128xf32>
    %cst_60 = arith.constant 1.000000e+00 : f32
    %247 = vector.broadcast %cst_60 : f32 to vector<8x128xf32>
    %248 = arith.addf %247, %246 : vector<8x128xf32>
    %249 = arith.divf %247, %248 : vector<8x128xf32>
    %250 = vector.extract_strided_slice %249 {offsets = [0, 0], sizes = [8, 32], strides = [1, 1]} : vector<8x128xf32> to vector<8x32xf32>
    %251 = vector.extract_strided_slice %249 {offsets = [0, 32], sizes = [8, 32], strides = [1, 1]} : vector<8x128xf32> to vector<8x32xf32>
    %252 = vector.extract_strided_slice %249 {offsets = [0, 64], sizes = [8, 32], strides = [1, 1]} : vector<8x128xf32> to vector<8x32xf32>
    %cst_61 = arith.constant 2.000000e+00 : f32
    %253 = vector.broadcast %cst_61 : f32 to vector<8x32xf32>
    %254 = arith.mulf %253, %252 : vector<8x32xf32>
    %cst_62 = arith.constant 1.000000e+00 : f32
    %255 = vector.broadcast %cst_62 : f32 to vector<8x32xf32>
    %256 = arith.subf %254, %255 : vector<8x32xf32>
    %257 = vector.extract_strided_slice %249 {offsets = [0, 96], sizes = [8, 32], strides = [1, 1]} : vector<8x128xf32> to vector<8x32xf32>
    %258 = arith.mulf %251, %238 : vector<8x32xf32>
    %259 = arith.mulf %250, %256 : vector<8x32xf32>
    %260 = arith.addf %258, %259 : vector<8x32xf32>
    %261 = math.tanh %260 : vector<8x32xf32>
    %262 = arith.mulf %257, %261 : vector<8x32xf32>
    %263 = vector.extract_strided_slice %194 {offsets = [3, 0, 0], sizes = [1, 8, 128], strides = [1, 1, 1]} : vector<8x8x128xf32> to vector<1x8x128xf32>
    %264 = vector.shape_cast %263 : vector<1x8x128xf32> to vector<8x128xf32>
    %cst_63 = arith.constant dense<0.000000e+00> : vector<8x128xf32>
    %265 = tpu.matmul %262, %189, %cst_63 {dimension_numbers = #tpu.dot_dimension_numbers<[1], [0], [0], [1], [0, 0, 1, 1], [], []>} : vector<8x32xf32>, vector<32x128xf32>, vector<8x128xf32> -> vector<8x128xf32>
    %266 = arith.addf %264, %265 : vector<8x128xf32>
    %267 = arith.negf %266 : vector<8x128xf32>
    %268 = math.exp %267 : vector<8x128xf32>
    %cst_64 = arith.constant 1.000000e+00 : f32
    %269 = vector.broadcast %cst_64 : f32 to vector<8x128xf32>
    %270 = arith.addf %269, %268 : vector<8x128xf32>
    %271 = arith.divf %269, %270 : vector<8x128xf32>
    %272 = vector.extract_strided_slice %271 {offsets = [0, 0], sizes = [8, 32], strides = [1, 1]} : vector<8x128xf32> to vector<8x32xf32>
    %273 = vector.extract_strided_slice %271 {offsets = [0, 32], sizes = [8, 32], strides = [1, 1]} : vector<8x128xf32> to vector<8x32xf32>
    %274 = vector.extract_strided_slice %271 {offsets = [0, 64], sizes = [8, 32], strides = [1, 1]} : vector<8x128xf32> to vector<8x32xf32>
    %cst_65 = arith.constant 2.000000e+00 : f32
    %275 = vector.broadcast %cst_65 : f32 to vector<8x32xf32>
    %276 = arith.mulf %275, %274 : vector<8x32xf32>
    %cst_66 = arith.constant 1.000000e+00 : f32
    %277 = vector.broadcast %cst_66 : f32 to vector<8x32xf32>
    %278 = arith.subf %276, %277 : vector<8x32xf32>
    %279 = vector.extract_strided_slice %271 {offsets = [0, 96], sizes = [8, 32], strides = [1, 1]} : vector<8x128xf32> to vector<8x32xf32>
    %280 = arith.mulf %273, %260 : vector<8x32xf32>
    %281 = arith.mulf %272, %278 : vector<8x32xf32>
    %282 = arith.addf %280, %281 : vector<8x32xf32>
    %283 = math.tanh %282 : vector<8x32xf32>
    %284 = arith.mulf %279, %283 : vector<8x32xf32>
    %285 = vector.extract_strided_slice %194 {offsets = [4, 0, 0], sizes = [1, 8, 128], strides = [1, 1, 1]} : vector<8x8x128xf32> to vector<1x8x128xf32>
    %286 = vector.shape_cast %285 : vector<1x8x128xf32> to vector<8x128xf32>
    %cst_67 = arith.constant dense<0.000000e+00> : vector<8x128xf32>
    %287 = tpu.matmul %284, %189, %cst_67 {dimension_numbers = #tpu.dot_dimension_numbers<[1], [0], [0], [1], [0, 0, 1, 1], [], []>} : vector<8x32xf32>, vector<32x128xf32>, vector<8x128xf32> -> vector<8x128xf32>
    %288 = arith.addf %286, %287 : vector<8x128xf32>
    %289 = arith.negf %288 : vector<8x128xf32>
    %290 = math.exp %289 : vector<8x128xf32>
    %cst_68 = arith.constant 1.000000e+00 : f32
    %291 = vector.broadcast %cst_68 : f32 to vector<8x128xf32>
    %292 = arith.addf %291, %290 : vector<8x128xf32>
    %293 = arith.divf %291, %292 : vector<8x128xf32>
    %294 = vector.extract_strided_slice %293 {offsets = [0, 0], sizes = [8, 32], strides = [1, 1]} : vector<8x128xf32> to vector<8x32xf32>
    %295 = vector.extract_strided_slice %293 {offsets = [0, 32], sizes = [8, 32], strides = [1, 1]} : vector<8x128xf32> to vector<8x32xf32>
    %296 = vector.extract_strided_slice %293 {offsets = [0, 64], sizes = [8, 32], strides = [1, 1]} : vector<8x128xf32> to vector<8x32xf32>
    %cst_69 = arith.constant 2.000000e+00 : f32
    %297 = vector.broadcast %cst_69 : f32 to vector<8x32xf32>
    %298 = arith.mulf %297, %296 : vector<8x32xf32>
    %cst_70 = arith.constant 1.000000e+00 : f32
    %299 = vector.broadcast %cst_70 : f32 to vector<8x32xf32>
    %300 = arith.subf %298, %299 : vector<8x32xf32>
    %301 = vector.extract_strided_slice %293 {offsets = [0, 96], sizes = [8, 32], strides = [1, 1]} : vector<8x128xf32> to vector<8x32xf32>
    %302 = arith.mulf %295, %282 : vector<8x32xf32>
    %303 = arith.mulf %294, %300 : vector<8x32xf32>
    %304 = arith.addf %302, %303 : vector<8x32xf32>
    %305 = math.tanh %304 : vector<8x32xf32>
    %306 = arith.mulf %301, %305 : vector<8x32xf32>
    %307 = vector.extract_strided_slice %194 {offsets = [5, 0, 0], sizes = [1, 8, 128], strides = [1, 1, 1]} : vector<8x8x128xf32> to vector<1x8x128xf32>
    %308 = vector.shape_cast %307 : vector<1x8x128xf32> to vector<8x128xf32>
    %cst_71 = arith.constant dense<0.000000e+00> : vector<8x128xf32>
    %309 = tpu.matmul %306, %189, %cst_71 {dimension_numbers = #tpu.dot_dimension_numbers<[1], [0], [0], [1], [0, 0, 1, 1], [], []>} : vector<8x32xf32>, vector<32x128xf32>, vector<8x128xf32> -> vector<8x128xf32>
    %310 = arith.addf %308, %309 : vector<8x128xf32>
    %311 = arith.negf %310 : vector<8x128xf32>
    %312 = math.exp %311 : vector<8x128xf32>
    %cst_72 = arith.constant 1.000000e+00 : f32
    %313 = vector.broadcast %cst_72 : f32 to vector<8x128xf32>
    %314 = arith.addf %313, %312 : vector<8x128xf32>
    %315 = arith.divf %313, %314 : vector<8x128xf32>
    %316 = vector.extract_strided_slice %315 {offsets = [0, 0], sizes = [8, 32], strides = [1, 1]} : vector<8x128xf32> to vector<8x32xf32>
    %317 = vector.extract_strided_slice %315 {offsets = [0, 32], sizes = [8, 32], strides = [1, 1]} : vector<8x128xf32> to vector<8x32xf32>
    %318 = vector.extract_strided_slice %315 {offsets = [0, 64], sizes = [8, 32], strides = [1, 1]} : vector<8x128xf32> to vector<8x32xf32>
    %cst_73 = arith.constant 2.000000e+00 : f32
    %319 = vector.broadcast %cst_73 : f32 to vector<8x32xf32>
    %320 = arith.mulf %319, %318 : vector<8x32xf32>
    %cst_74 = arith.constant 1.000000e+00 : f32
    %321 = vector.broadcast %cst_74 : f32 to vector<8x32xf32>
    %322 = arith.subf %320, %321 : vector<8x32xf32>
    %323 = vector.extract_strided_slice %315 {offsets = [0, 96], sizes = [8, 32], strides = [1, 1]} : vector<8x128xf32> to vector<8x32xf32>
    %324 = arith.mulf %317, %304 : vector<8x32xf32>
    %325 = arith.mulf %316, %322 : vector<8x32xf32>
    %326 = arith.addf %324, %325 : vector<8x32xf32>
    %327 = math.tanh %326 : vector<8x32xf32>
    %328 = arith.mulf %323, %327 : vector<8x32xf32>
    %329 = vector.extract_strided_slice %194 {offsets = [6, 0, 0], sizes = [1, 8, 128], strides = [1, 1, 1]} : vector<8x8x128xf32> to vector<1x8x128xf32>
    %330 = vector.shape_cast %329 : vector<1x8x128xf32> to vector<8x128xf32>
    %cst_75 = arith.constant dense<0.000000e+00> : vector<8x128xf32>
    %331 = tpu.matmul %328, %189, %cst_75 {dimension_numbers = #tpu.dot_dimension_numbers<[1], [0], [0], [1], [0, 0, 1, 1], [], []>} : vector<8x32xf32>, vector<32x128xf32>, vector<8x128xf32> -> vector<8x128xf32>
    %332 = arith.addf %330, %331 : vector<8x128xf32>
    %333 = arith.negf %332 : vector<8x128xf32>
    %334 = math.exp %333 : vector<8x128xf32>
    %cst_76 = arith.constant 1.000000e+00 : f32
    %335 = vector.broadcast %cst_76 : f32 to vector<8x128xf32>
    %336 = arith.addf %335, %334 : vector<8x128xf32>
    %337 = arith.divf %335, %336 : vector<8x128xf32>
    %338 = vector.extract_strided_slice %337 {offsets = [0, 0], sizes = [8, 32], strides = [1, 1]} : vector<8x128xf32> to vector<8x32xf32>
    %339 = vector.extract_strided_slice %337 {offsets = [0, 32], sizes = [8, 32], strides = [1, 1]} : vector<8x128xf32> to vector<8x32xf32>
    %340 = vector.extract_strided_slice %337 {offsets = [0, 64], sizes = [8, 32], strides = [1, 1]} : vector<8x128xf32> to vector<8x32xf32>
    %cst_77 = arith.constant 2.000000e+00 : f32
    %341 = vector.broadcast %cst_77 : f32 to vector<8x32xf32>
    %342 = arith.mulf %341, %340 : vector<8x32xf32>
    %cst_78 = arith.constant 1.000000e+00 : f32
    %343 = vector.broadcast %cst_78 : f32 to vector<8x32xf32>
    %344 = arith.subf %342, %343 : vector<8x32xf32>
    %345 = vector.extract_strided_slice %337 {offsets = [0, 96], sizes = [8, 32], strides = [1, 1]} : vector<8x128xf32> to vector<8x32xf32>
    %346 = arith.mulf %339, %326 : vector<8x32xf32>
    %347 = arith.mulf %338, %344 : vector<8x32xf32>
    %348 = arith.addf %346, %347 : vector<8x32xf32>
    %349 = math.tanh %348 : vector<8x32xf32>
    %350 = arith.mulf %345, %349 : vector<8x32xf32>
    %351 = vector.extract_strided_slice %194 {offsets = [7, 0, 0], sizes = [1, 8, 128], strides = [1, 1, 1]} : vector<8x8x128xf32> to vector<1x8x128xf32>
    %352 = vector.shape_cast %351 : vector<1x8x128xf32> to vector<8x128xf32>
    %cst_79 = arith.constant dense<0.000000e+00> : vector<8x128xf32>
    %353 = tpu.matmul %350, %189, %cst_79 {dimension_numbers = #tpu.dot_dimension_numbers<[1], [0], [0], [1], [0, 0, 1, 1], [], []>} : vector<8x32xf32>, vector<32x128xf32>, vector<8x128xf32> -> vector<8x128xf32>
    %354 = arith.addf %352, %353 : vector<8x128xf32>
    %355 = arith.negf %354 : vector<8x128xf32>
    %356 = math.exp %355 : vector<8x128xf32>
    %cst_80 = arith.constant 1.000000e+00 : f32
    %357 = vector.broadcast %cst_80 : f32 to vector<8x128xf32>
    %358 = arith.addf %357, %356 : vector<8x128xf32>
    %359 = arith.divf %357, %358 : vector<8x128xf32>
    %360 = vector.extract_strided_slice %359 {offsets = [0, 0], sizes = [8, 32], strides = [1, 1]} : vector<8x128xf32> to vector<8x32xf32>
    %361 = vector.extract_strided_slice %359 {offsets = [0, 32], sizes = [8, 32], strides = [1, 1]} : vector<8x128xf32> to vector<8x32xf32>
    %362 = vector.extract_strided_slice %359 {offsets = [0, 64], sizes = [8, 32], strides = [1, 1]} : vector<8x128xf32> to vector<8x32xf32>
    %cst_81 = arith.constant 2.000000e+00 : f32
    %363 = vector.broadcast %cst_81 : f32 to vector<8x32xf32>
    %364 = arith.mulf %363, %362 : vector<8x32xf32>
    %cst_82 = arith.constant 1.000000e+00 : f32
    %365 = vector.broadcast %cst_82 : f32 to vector<8x32xf32>
    %366 = arith.subf %364, %365 : vector<8x32xf32>
    %367 = vector.extract_strided_slice %359 {offsets = [0, 96], sizes = [8, 32], strides = [1, 1]} : vector<8x128xf32> to vector<8x32xf32>
    %368 = arith.mulf %361, %348 : vector<8x32xf32>
    %369 = arith.mulf %360, %366 : vector<8x32xf32>
    %370 = arith.addf %368, %369 : vector<8x32xf32>
    %371 = math.tanh %370 : vector<8x32xf32>
    %372 = arith.mulf %367, %371 : vector<8x32xf32>
    %c0_83 = arith.constant 0 : index
    %c0_84 = arith.constant 0 : index
    %373 = vector.load %arg7[%c0_83, %c0_84] : memref<32x16xf32, #tpu.memory_space<vmem>>, vector<32x16xf32>
    %cst_85 = arith.constant dense<0.000000e+00> : vector<8x16xf32>
    %374 = tpu.matmul %372, %373, %cst_85 {dimension_numbers = #tpu.dot_dimension_numbers<[1], [0], [0], [1], [0, 0, 1, 1], [], []>} : vector<8x32xf32>, vector<32x16xf32>, vector<8x16xf32> -> vector<8x16xf32>
    %c0_86 = arith.constant 0 : index
    %c0_87 = arith.constant 0 : index
    %375 = vector.load %arg8[%c0_86, %c0_87] : memref<1x16xf32, #tpu.memory_space<vmem>>, vector<1x16xf32>
    %376 = vector.broadcast %375 : vector<1x16xf32> to vector<8x16xf32>
    %377 = arith.addf %374, %376 : vector<8x16xf32>
    %c0_88 = arith.constant 0 : index
    %c0_89 = arith.constant 0 : index
    %378 = vector.load %arg9[%c0_88, %c0_89] : memref<8x16xf32, #tpu.memory_space<vmem>>, vector<8x16xf32>
    tpu.vector_store %arg9[%c0_88, %c0_89], %377 {strides = array<i32>} : memref<8x16xf32, #tpu.memory_space<vmem>>, vector<8x16xf32>,
    return
  }
}

</mosaic_0001>

<bundles_post_ra>
// kernel: deeplog_forward.1
= control target key start
LH: loop header
LB: loop body
LE: loop exit
PB: predicated region body
PF: predicated region fallthrough
CT: control target
= control target key end

     0   :  { %vm52_vm0 = vcmask 64512   ;;  %v2613_v0 = vmov 0.0|0.0   ;;  %vm2614_vm1 = vmmov 0   ;;  %v2615_v4 = vmov 0.0   ;;  %s2616_s23 = smov 64   ;;  %s3033_s2 = inlined_call_operand.vmem [shape: f32[32,128], index: 2, kind: input, shape index: {}]   ;;  %s3034_s1 = inlined_call_operand.vmem [shape: f32[8,128], index: 1, kind: input, shape index: {}]   ;;  %s3035_s0 = inlined_call_operand.vmem [shape: f32[8,8,8], index: 0, kind: input, shape index: {}]   ;;  %s3036_s3 = inlined_call_operand.vmem [shape: f32[1,128], index: 3, kind: input, shape index: {}]   ;;  %s3037_s4 = inlined_call_operand.vmem [shape: f32[32,128], index: 4, kind: input, shape index: {}]   ;;  %s3038_s5 = inlined_call_operand.vmem [shape: f32[32,128], index: 5, kind: input, shape index: {}]   ;;  %s3039_s6 = inlined_call_operand.vmem [shape: f32[1,128], index: 6, kind: input, shape index: {}]   ;;  %s3040_s7 = inlined_call_operand.vmem [shape: f32[32,16], index: 7, kind: input, shape index: {}]   ;;  %s3041_s8 = inlined_call_operand.vmem [shape: f32[1,16], index: 8, kind: input, shape index: {}]   ;;  %s3042_s9 = inlined_call_operand.vmem [shape: f32[8,16], index: 9, kind: output, shape index: {}]  }
   0x1   :  { %2402 = vmatprep.subr.bf16.mxu1 %v2613_v0  ;;  %v41_v1 = vld [vmem:[%s3033_s2] sm:$0xff]  ;;  %v42_v2 = vld [vmem:[%s3033_s2 + $0x8] sm:$0xff]  ;;  %2203 = vmatprep.mubr.msk.f32.mxu1 %vm2614_vm1, %v2615_v4  ;;  %v43_v8 = vld [vmem:[%s3033_s2 + $0x10] sm:$0xff]  ;;  %vm182_vm2 = vcmask 261120   ;;  %vm2003_vm3 = vcmask 130048  }
   0x2   :  { %v40_v3 = vld [vmem:[%s3034_s1] sm:$0xff]  ;;  %v2680_v5 = vpack.c.bf16 %v42_v2, %v41_v1  ;;  %v33_v7 = vld [vmem:[%s3035_s0 + $0x8] sm:$0xff]  ;;  %v44_v9 = vld [vmem:[%s3033_s2 + $0x18] sm:$0xff] }
   0x3   :  { %2181 = vmatprep.subr.mxu0 %v40_v3  ;;  %v32_v6 = vld [vmem:[%s3035_s0] sm:$0xff]  ;;  %v2697_v10 = vpack.c.bf16 %v44_v9, %v43_v8  ;;  %v34_v48 = vld [vmem:[%s3035_s0 + $0x10] sm:$0xff]  ;;  %v35_v49 = vld [vmem:[%s3035_s0 + $0x18] sm:$0xff] }
   0x4   :  { %2182 = vmatpush3.msra.mxu0 %v40_v3  ;;  %2183 = vmatprep.mubr.msk.f32.mxu0 %vm52_vm0, %v32_v6  ;;  %v2717_v12 = vld [vmem:[%s3036_s3] ss:$0 sm:$0xff]  ;;  %s2617_s3 = smov 32   ;;  %v37_v51 = vld [vmem:[%s3035_s0 + $0x28] sm:$0xff]  ;;  %v38_v52 = vld [vmem:[%s3035_s0 + $0x30] sm:$0xff] }
   0x5   :  { %2404 = vmatpush3.bf16.msra.mxu1 %v2680_v5  ;;  %2184 = vmatmul.mubr.msk.f32.vlgmr.msra.gmra.mrb[0].mxu0 %vm52_vm0, %v33_v7  ;;  %v36_v50 = vld [vmem:[%s3035_s0 + $0x20] sm:$0xff]  ;;  %v39_v53 = vld [vmem:[%s3035_s0 + $0x38] sm:$0xff] }
   0x6   :  { %2405 = vmatprep.subr.bf16.mxu1 %v2613_v0  ;;  %2414 = vmatprep.subr.bf16.mxu0 %v2613_v0 }
   0x7   :  { %2416 = vmatpush3.bf16.msra.mxu0 %v2680_v5  ;;  %2186 = vmatprep.mubr.msk.f32.mxu0 %vm52_vm0, %v34_v48 }
   0x8   :  { %2417 = vmatprep.subr.bf16.mxu0 %v2613_v0 }
   0x9   :  { %2407 = vmatpush3.bf16.msra.mxu1 %v2697_v10  ;;  %2187 = vmatmul.mubr.msk.f32.gmra.mrb[2].mxu0 %vm52_vm0, %v35_v49 }
   0xa   :  { %2408 = vmatprep.subr.bf16.mxu1 %v2613_v0  ;;  %2189 = vmatprep.mubr.msk.f32.mxu0 %vm52_vm0, %v36_v50 }
   0xb   :  { %2419 = vmatpush3.bf16.msra.mxu0 %v2697_v10 }
   0xc   :  { %2204 = vmatmul.mubr.f32.vlgmr.msra.gmra.mrb[0].mxu1 %v2615_v4  ;;  %2426 = vmatprep.subr.bf16.mxu0 %v2613_v0 }
   0xd   :  { %2410 = vmatpush3.bf16.msra.mxu1 %v2680_v5  ;;  %2214 = vmatprep.mubr.msk.f32.mxu1 %vm2614_vm1, %v2615_v4 }
   0xe   :  { %2411 = vmatprep.subr.bf16.mxu1 %v2613_v0  ;;  %2190 = vmatmul.mubr.msk.f32.gmra.mrb[4].mxu0 %vm52_vm0, %v37_v51 }
   0xf   :  { %2192 = vmatprep.mubr.msk.f32.mxu0 %vm52_vm0, %v38_v52 }
  0x11   :  { %2413 = vmatpush3.bf16.msra.mxu1 %v2697_v10 }
  0x12   :  { %2420 = vmatprep.subr.bf16.mxu1 %v2613_v0  ;;  %2193 = vmatmul.mubr.msk.f32.gmra.mrb[6].mxu0 %vm52_vm0, %v39_v53 }
  0x13   :  { %2225 = vmatprep.mubr.msk.f32.mxu0 %vm2614_vm1, %v2615_v4 }
  0xd8   :  { %v2185_v11 = vpop.f32.mrb[0].mxu0 }
  0xd9   :  { %v143_v13 = vpop.f32.mrb[1].mxu0  ;;  %v149_v33 = vadd.f32 %v2185_v11, %v2717_v12 }
  0xda   :  { %v144_v14 = vadd.f32 %v2717_v12, %v143_v13 }
  0xdc   :  { %v2188_v57 = vpop.f32.mrb[2].mxu0 }
  0xdd   :  { %v153_v58 = vpop.f32.mrb[3].mxu0 }
  0xde   :  { %v154_v1 = vadd.f32 %v2717_v12, %v153_v58 }
  0xdf   :  { %v252_v15 = vpop.f32.mrb[0].mxu1 }
  0xe0   :  { %v256_v16 = vadd.f32 %v252_v15, %v144_v14  ;;  %v2205_v17 = vpop.f32.mrb[1].mxu1 }
  0xe1   :  { %v2765_v59 = vpop.f32.mrb[4].mxu0 }
  0xe2   :  { %v2018_v18 = vmul.f32 -1.442695, %v256_v16  ;;  %v2767_v60 = vpop.f32.mrb[5].mxu0 }
  0xe4   :  { %2517 = vpow2.f32 %v2018_v18 }
  0xe5   :  { %v2769_v61 = vpop.f32.mrb[6].mxu0 }
  0xe6   :  { %v2771_v62 = vpop.f32.mrb[7].mxu0 }
  0xee   :  { %v2518_v19 = vpop.eup %2517 }
  0xef   :  { %v260_v20 = vadd.f32 1.0, %v2518_v19 }
  0xf1   :  { %2519 = vrcp.f32 %v260_v20 }
  0xfb   :  { %v2520_v21 = vpop.eup %2519 }
  0xfc   :  { %v263_v22 = vmul.f32 2.0, %v2520_v21  ;;  %v265_v26 = vmul.f32 0.0, %v2520_v21 }
  0xfe   :  { %v2019_v23 = vadd.f32 -1.0, %v263_v22 }
 0x100   :  { %267 = vrot.lane.b32.xlu0 %v2019_v23, %s2616_s23 }
 0x172   :  { %v268_v24 = vpop.permute.xlu0 %267 }
 0x173   :  { %v270_v25 = vmul.f32 %v2520_v21, %v268_v24  ;;  %v159_v24 = vadd.f32 %v2188_v57, %v2717_v12 }
 0x175   :  { %272 = vrot.lane.b32.xlu0 %v270_v25, %s2617_s3 }
 0x1e7   :  { %v273_v27 = vpop.permute.xlu0 %272 }
 0x1e8   :  { %v275_v28 = vadd.f32 %v273_v27, %v265_v26 }
 0x1ea   :  { %2521 = vtanh.f32 %v275_v28 }
 0x1f4   :  { %v2522_v29 = vpop.eup %2521 }
 0x1f5   :  { %278 = vrot.lane.b32.xlu1 %v2522_v29, %s2616_s23 }
 0x267   :  { %v279_v30 = vpop.permute.xlu1 %278 }
 0x268   :  { %v281_v31 = vmul.f32 %v2520_v21, %v279_v30 }
 0x26a   :  { %283 = vrot.lane.b32.xlu1 %v281_v31, %s2617_s3 }
 0x2dc   :  { %v2724_v32 = vpop.permute.xlu1 %283 }
 0x2dd   :  { %2215 = vmatmul.mubr.msk.f32.vlgmr.msra.gmra.mrb[2].mxu1 %vm182_vm2, %v2724_v32 }
 0x2de   :  { %2422 = vmatpush3.bf16.msra.mxu1 %v2680_v5  ;;  %2236 = vmatprep.mubr.msk.f32.mxu1 %vm2614_vm1, %v2615_v4 }
 0x2df   :  { %2423 = vmatprep.subr.bf16.mxu1 %v2613_v0 }
 0x2e2   :  { %2425 = vmatpush3.bf16.msra.mxu1 %v2697_v10 }
 0x2e3   :  { %2432 = vmatprep.subr.bf16.mxu1 %v2613_v0 }
 0x3b0   :  { %v353_v34 = vpop.f32.mrb[2].mxu1 }
 0x3b1   :  { %v357_v35 = vadd.f32 %v353_v34, %v149_v33  ;;  %v2216_v36 = vpop.f32.mrb[3].mxu1 }
 0x3b3   :  { %v2021_v37 = vmul.f32 -1.442695, %v357_v35 }
 0x3b5   :  { %2523 = vpow2.f32 %v2021_v37 }
 0x3bf   :  { %v2524_v38 = vpop.eup %2523 }
 0x3c0   :  { %v361_v39 = vadd.f32 1.0, %v2524_v38 }
 0x3c2   :  { %2525 = vrcp.f32 %v361_v39 }
 0x3cc   :  { %v2526_v40 = vpop.eup %2525 }
 0x3cd   :  { %v364_v41 = vmul.f32 2.0, %v2526_v40  ;;  %v366_v45 = vmul.f32 %v2526_v40, %v275_v28 }
 0x3cf   :  { %v2022_v42 = vadd.f32 -1.0, %v364_v41 }
 0x3d1   :  { %368 = vrot.lane.b32.xlu0 %v2022_v42, %s2616_s23 }
 0x443   :  { %v369_v43 = vpop.permute.xlu0 %368 }
 0x444   :  { %v371_v44 = vmul.f32 %v2526_v40, %v369_v43 }
 0x446   :  { %373 = vrot.lane.b32.xlu1 %v371_v44, %s2617_s3  ;;  %v164_v44 = vadd.f32 %v2717_v12, %v2767_v60 }
 0x4b8   :  { %v374_v46 = vpop.permute.xlu1 %373 }
 0x4b9   :  { %v376_v47 = vadd.f32 %v374_v46, %v366_v45 }
 0x4bb   :  { %2527 = vtanh.f32 %v376_v47 }
 0x4c5   :  { %v2528_v54 = vpop.eup %2527 }
 0x4c6   :  { %379 = vrot.lane.b32.xlu0 %v2528_v54, %s2616_s23 }
 0x538   :  { %v380_v55 = vpop.permute.xlu0 %379 }
 0x539   :  { %v382_v56 = vmul.f32 %v2526_v40, %v380_v55 }
 0x53b   :  { %384 = vrot.lane.b32.xlu1 %v382_v56, %s2617_s3 }
 0x5ad   :  { %v2773_v63 = vpop.permute.xlu1 %384 }
 0x5ae   :  { %2226 = vmatmul.mubr.msk.f32.vlgmr.msra.gmra.mrb[8].mxu0 %vm182_vm2, %v2773_v63 }
 0x5af   :  { %2428 = vmatpush3.bf16.msra.mxu0 %v2680_v5  ;;  %2247 = vmatprep.mubr.msk.f32.mxu0 %vm2614_vm1, %v2615_v4 }
 0x5b0   :  { %2429 = vmatprep.subr.bf16.mxu0 %v2613_v0 }
 0x5b3   :  { %2431 = vmatpush3.bf16.msra.mxu0 %v2697_v10 }
 0x5b4   :  { %2438 = vmatprep.subr.bf16.mxu0 %v2613_v0 }
 0x681   :  { %v454_v2 = vpop.f32.mrb[8].mxu0 }
 0x682   :  { %v458_v3 = vadd.f32 %v454_v2, %v154_v1  ;;  %v2227_v6 = vpop.f32.mrb[9].mxu0 }
 0x683   :  { %v169_v6 = vadd.f32 %v2765_v59, %v2717_v12 }
 0x684   :  { %v2024_v7 = vmul.f32 -1.442695, %v458_v3 }
 0x686   :  { %2529 = vpow2.f32 %v2024_v7 }
 0x690   :  { %v2530_v8 = vpop.eup %2529 }
 0x691   :  { %v462_v9 = vadd.f32 1.0, %v2530_v8 }
 0x693   :  { %2531 = vrcp.f32 %v462_v9 }
 0x69d   :  { %v2532_v11 = vpop.eup %2531 }
 0x69e   :  { %v465_v13 = vmul.f32 2.0, %v2532_v11  ;;  %v467_v17 = vmul.f32 %v2532_v11, %v376_v47 }
 0x6a0   :  { %v2025_v14 = vadd.f32 -1.0, %v465_v13 }
 0x6a2   :  { %469 = vrot.lane.b32.xlu0 %v2025_v14, %s2616_s23 }
 0x714   :  { %v470_v15 = vpop.permute.xlu0 %469 }
 0x715   :  { %v472_v16 = vmul.f32 %v2532_v11, %v470_v15 }
 0x717   :  { %474 = vrot.lane.b32.xlu1 %v472_v16, %s2617_s3 }
 0x789   :  { %v475_v18 = vpop.permute.xlu1 %474 }
 0x78a   :  { %v477_v19 = vadd.f32 %v475_v18, %v467_v17 }
 0x78c   :  { %2533 = vtanh.f32 %v477_v19 }
 0x796   :  { %v2534_v20 = vpop.eup %2533 }
 0x797   :  { %480 = vrot.lane.b32.xlu0 %v2534_v20, %s2616_s23  ;;  %v989_v20 = vld [vmem:[%s3037_s4] sm:$0xff] }
 0x809   :  { %v481_v21 = vpop.permute.xlu0 %480 }
 0x80a   :  { %v483_v22 = vmul.f32 %v2532_v11, %v481_v21  ;;  %v990_v21 = vld [vmem:[%s3037_s4 + $0x8] sm:$0xff] }
 0x80c   :  { %485 = vrot.lane.b32.xlu1 %v483_v22, %s2617_s3  ;;  %v2450_v22 = vpack.c.bf16 %v990_v21, %v989_v20 }
 0x87e   :  { %v2788_v23 = vpop.permute.xlu1 %485 }
 0x87f   :  { %2237 = vmatmul.mubr.msk.f32.vlgmr.msra.gmra.mrb[4].mxu1 %vm182_vm2, %v2788_v23 }
 0x880   :  { %2434 = vmatpush3.bf16.msra.mxu1 %v2680_v5  ;;  %2258 = vmatprep.mubr.msk.f32.mxu1 %vm2614_vm1, %v2615_v4 }
 0x881   :  { %2435 = vmatprep.subr.bf16.mxu1 %v2613_v0 }
 0x884   :  { %2437 = vmatpush3.bf16.msra.mxu1 %v2697_v10 }
 0x885   :  { %2444 = vmatprep.subr.bf16.mxu1 %v2613_v0 }
 0x952   :  { %v555_v25 = vpop.f32.mrb[4].mxu1 }
 0x953   :  { %v559_v26 = vadd.f32 %v555_v25, %v159_v24  ;;  %v2238_v27 = vpop.f32.mrb[5].mxu1 }
 0x954   :  { %v991_v27 = vld [vmem:[%s3037_s4 + $0x10] sm:$0xff] }
 0x955   :  { %v2027_v28 = vmul.f32 -1.442695, %v559_v26 }
 0x957   :  { %2535 = vpow2.f32 %v2027_v28  ;;  %v992_v28 = vld [vmem:[%s3037_s4 + $0x18] sm:$0xff] }
 0x961   :  { %v2536_v29 = vpop.eup %2535 }
 0x962   :  { %v563_v30 = vadd.f32 1.0, %v2536_v29  ;;  %v2454_v29 = vpack.c.bf16 %v992_v28, %v991_v27 }
 0x964   :  { %2537 = vrcp.f32 %v563_v30 }
 0x96e   :  { %v2538_v31 = vpop.eup %2537 }
 0x96f   :  { %v566_v33 = vmul.f32 2.0, %v2538_v31  ;;  %v568_v37 = vmul.f32 %v2538_v31, %v477_v19 }
 0x971   :  { %v2028_v34 = vadd.f32 -1.0, %v566_v33 }
 0x973   :  { %570 = vrot.lane.b32.xlu0 %v2028_v34, %s2616_s23 }
 0x9e5   :  { %v571_v35 = vpop.permute.xlu0 %570 }
 0x9e6   :  { %v573_v36 = vmul.f32 %v2538_v31, %v571_v35 }
 0x9e8   :  { %575 = vrot.lane.b32.xlu1 %v573_v36, %s2617_s3 }
 0xa5a   :  { %v576_v38 = vpop.permute.xlu1 %575 }
 0xa5b   :  { %v578_v39 = vadd.f32 %v576_v38, %v568_v37 }
 0xa5d   :  { %2539 = vtanh.f32 %v578_v39 }
 0xa67   :  { %v2540_v40 = vpop.eup %2539 }
 0xa68   :  { %581 = vrot.lane.b32.xlu0 %v2540_v40, %s2616_s23 }
 0xada   :  { %v582_v41 = vpop.permute.xlu0 %581 }
 0xadb   :  { %v584_v42 = vmul.f32 %v2538_v31, %v582_v41 }
 0xadd   :  { %586 = vrot.lane.b32.xlu1 %v584_v42, %s2617_s3 }
 0xb4f   :  { %v2803_v43 = vpop.permute.xlu1 %586 }
 0xb50   :  { %2248 = vmatmul.mubr.msk.f32.vlgmr.msra.gmra.mrb[10].mxu0 %vm182_vm2, %v2803_v43 }
 0xb51   :  { %2440 = vmatpush3.bf16.msra.mxu0 %v2680_v5  ;;  %2269 = vmatprep.mubr.msk.f32.mxu0 %vm2614_vm1, %v2615_v4 }
 0xb52   :  { %2441 = vmatprep.subr.bf16.mxu0 %v2613_v0 }
 0xb55   :  { %2443 = vmatpush3.bf16.msra.mxu0 %v2697_v10 }
 0xb56   :  { %2451 = vmatprep.subr.bf16.mxu0 %v2450_v22 }
 0xc23   :  { %v656_v45 = vpop.f32.mrb[10].mxu0 }
 0xc24   :  { %v660_v46 = vadd.f32 %v656_v45, %v164_v44  ;;  %v2249_v47 = vpop.f32.mrb[11].mxu0 }
 0xc26   :  { %v2030_v48 = vmul.f32 -1.442695, %v660_v46 }
 0xc28   :  { %2541 = vpow2.f32 %v2030_v48 }
 0xc32   :  { %v2542_v49 = vpop.eup %2541 }
 0xc33   :  { %v664_v50 = vadd.f32 1.0, %v2542_v49 }
 0xc35   :  { %2543 = vrcp.f32 %v664_v50  ;;  %v993_v50 = vld [vmem:[%s3038_s5] sm:$0xff] }
 0xc3f   :  { %v2544_v51 = vpop.eup %2543 }
 0xc40   :  { %v667_v52 = vmul.f32 2.0, %v2544_v51  ;;  %v669_v56 = vmul.f32 %v2544_v51, %v578_v39 }
 0xc42   :  { %v2031_v53 = vadd.f32 -1.0, %v667_v52 }
 0xc44   :  { %671 = vrot.lane.b32.xlu0 %v2031_v53, %s2616_s23  ;;  %v995_v53 = vld [vmem:[%s3038_s5 + $0x10] sm:$0xff] }
 0xcb6   :  { %v672_v54 = vpop.permute.xlu0 %671 }
 0xcb7   :  { %v674_v55 = vmul.f32 %v2544_v51, %v672_v54  ;;  %v996_v54 = vld [vmem:[%s3038_s5 + $0x18] sm:$0xff] }
 0xcb9   :  { %676 = vrot.lane.b32.xlu1 %v674_v55, %s2617_s3  ;;  %v2889_v55 = vpack.c.bf16 %v996_v54, %v995_v53 }
 0xd2b   :  { %v677_v57 = vpop.permute.xlu1 %676 }
 0xd2c   :  { %v679_v58 = vadd.f32 %v677_v57, %v669_v56 }
 0xd2e   :  { %2545 = vtanh.f32 %v679_v58 }
 0xd38   :  { %v2546_v60 = vpop.eup %2545 }
 0xd39   :  { %682 = vrot.lane.b32.xlu0 %v2546_v60, %s2616_s23  ;;  %v179_v60 = vadd.f32 %v2769_v61, %v2717_v12 }
 0xdab   :  { %v683_v1 = vpop.permute.xlu0 %682 }
 0xdac   :  { %v685_v2 = vmul.f32 %v2544_v51, %v683_v1  ;;  %v994_v51 = vld [vmem:[%s3038_s5 + $0x8] sm:$0xff] }
 0xdad   :  { %v2879_v52 = vpack.c.bf16 %v994_v51, %v993_v50 }
 0xdae   :  { %687 = vrot.lane.b32.xlu1 %v685_v2, %s2617_s3 }
 0xe20   :  { %v688_v3 = vpop.permute.xlu1 %687 }
 0xe21   :  { %2259 = vmatmul.mubr.msk.f32.vlgmr.msra.gmra.mrb[6].mxu1 %vm182_vm2, %v688_v3 }
 0xe22   :  { %2446 = vmatpush3.bf16.msra.mxu1 %v2680_v5  ;;  %2280 = vmatprep.mubr.msk.f32.mxu1 %vm2614_vm1, %v2615_v4 }
 0xe23   :  { %2447 = vmatprep.subr.bf16.mxu1 %v2613_v0 }
 0xe26   :  { %2449 = vmatpush3.bf16.msra.mxu1 %v2697_v10 }
 0xe27   :  { %2458 = vmatprep.subr.bf16.mxu1 %v2613_v0 }
 0xef4   :  { %v757_v7 = vpop.f32.mrb[6].mxu1 }
 0xef5   :  { %v761_v8 = vadd.f32 %v757_v7, %v169_v6  ;;  %v2260_v9 = vpop.f32.mrb[7].mxu1  ;;  %v2914_v6 = vld [vmem:[%s3039_s6] ss:$0 sm:$0xff] }
 0xef7   :  { %v2033_v11 = vmul.f32 -1.442695, %v761_v8 }
 0xef9   :  { %2547 = vpow2.f32 %v2033_v11 }
 0xf03   :  { %v2548_v13 = vpop.eup %2547 }
 0xf04   :  { %v765_v14 = vadd.f32 1.0, %v2548_v13 }
 0xf06   :  { %2549 = vrcp.f32 %v765_v14 }
 0xf10   :  { %v2550_v5 = vpop.eup %2549 }
 0xf11   :  { %v768_v15 = vmul.f32 2.0, %v2550_v5  ;;  %v770_v18 = vmul.f32 %v2550_v5, %v679_v58 }
 0xf13   :  { %v2034_v16 = vadd.f32 -1.0, %v768_v15 }
 0xf15   :  { %772 = vrot.lane.b32.xlu0 %v2034_v16, %s2616_s23 }
 0xf87   :  { %v773_v17 = vpop.permute.xlu0 %772 }
 0xf88   :  { %v775_v10 = vmul.f32 %v2550_v5, %v773_v17 }
 0xf8a   :  { %777 = vrot.lane.b32.xlu1 %v775_v10, %s2617_s3 }
 0xffc   :  { %v778_v19 = vpop.permute.xlu1 %777 }
 0xffd   :  { %v780_v59 = vadd.f32 %v778_v19, %v770_v18 }
 0xfff   :  { %2551 = vtanh.f32 %v780_v59 }
0x1009   :  { %v2552_v24 = vpop.eup %2551 }
0x100a   :  { %783 = vrot.lane.b32.xlu0 %v2552_v24, %s2616_s23 }
0x107c   :  { %v784_v25 = vpop.permute.xlu0 %783 }
0x107d   :  { %v786_v26 = vmul.f32 %v2550_v5, %v784_v25 }
0x107f   :  { %788 = vrot.lane.b32.xlu1 %v786_v26, %s2617_s3 }
0x10f1   :  { %v789_v30 = vpop.permute.xlu1 %788 }
0x10f2   :  { %2270 = vmatmul.mubr.msk.f32.vlgmr.msra.gmra.mrb[12].mxu0 %vm182_vm2, %v789_v30 }
0x10f3   :  { %2453 = vmatpush3.bf16.msra.mxu0 %v2450_v22  ;;  %2291 = vmatprep.mubr.msk.f32.mxu0 %vm182_vm2, %v2724_v32  ;;  %v174_v32 = vadd.f32 %v2717_v12, %v2771_v62 }
0x10f4   :  { %2455 = vmatprep.subr.bf16.mxu0 %v2454_v29 }
0x10f7   :  { %2457 = vmatpush3.bf16.msra.mxu0 %v2454_v29 }
0x10f8   :  { %2470 = vmatprep.subr.bf16.mxu0 %v2613_v0 }
0x10fa   :  { %2292 = vmatmul.mubr.msk.f32.vlgmr.msra.gmra.mrb[14].mxu0 %vm182_vm2, %v2773_v63 }
0x10fb   :  { %2294 = vmatprep.mubr.msk.f32.mxu0 %vm182_vm2, %v2788_v23  ;;  %2472 = vmatpush3.bf16.msra.mxu0 %v2879_v52 }
0x10fc   :  { %2473 = vmatprep.subr.bf16.mxu0 %v2613_v0 }
0x10fe   :  { %2295 = vmatmul.mubr.msk.f32.gmra.mrb[16].mxu0 %vm182_vm2, %v2803_v43 }
0x10ff   :  { %2297 = vmatprep.mubr.msk.f32.mxu0 %vm182_vm2, %v688_v3  ;;  %2475 = vmatpush3.bf16.msra.mxu0 %v2889_v55 }
0x1100   :  { %2482 = vmatprep.subr.bf16.mxu0 %v2613_v0 }
0x1102   :  { %2298 = vmatmul.mubr.msk.f32.gmra.mrb[18].mxu0 %vm182_vm2, %v789_v30 }
0x11c5   :  { %v858_v31 = vpop.f32.mrb[12].mxu0 }
0x11c6   :  { %v862_v33 = vadd.f32 %v858_v31, %v174_v32  ;;  %v2271_v34 = vpop.f32.mrb[13].mxu0 }
0x11c8   :  { %v2036_v35 = vmul.f32 -1.442695, %v862_v33 }
0x11ca   :  { %2553 = vpow2.f32 %v2036_v35 }
0x11cd   :  { %v2857_v36 = vpop.f32.mrb[14].mxu0 }
0x11ce   :  { %v1075_v63 = vpop.f32.mrb[15].mxu0 }
0x11cf   :  { %v1076_v7 = vadd.f32 %v2914_v6, %v1075_v63 }
0x11d1   :  { %v2859_v37 = vpop.f32.mrb[16].mxu0 }
0x11d2   :  { %v2861_v23 = vpop.f32.mrb[17].mxu0 }
0x11d4   :  { %v2554_v38 = vpop.eup %2553 }
0x11d5   :  { %v866_v39 = vadd.f32 1.0, %v2554_v38  ;;  %v2863_v40 = vpop.f32.mrb[18].mxu0 }
0x11d6   :  { %v2865_v41 = vpop.f32.mrb[19].mxu0 }
0x11d7   :  { %2555 = vrcp.f32 %v866_v39  ;;  %v1081_v39 = vadd.f32 %v2857_v36, %v2914_v6 }
0x11e1   :  { %v2556_v62 = vpop.eup %2555 }
0x11e2   :  { %v869_v42 = vmul.f32 2.0, %v2556_v62  ;;  %v871_v46 = vmul.f32 %v2556_v62, %v780_v59 }
0x11e4   :  { %v2037_v43 = vadd.f32 -1.0, %v869_v42 }
0x11e6   :  { %873 = vrot.lane.b32.xlu0 %v2037_v43, %s2616_s23 }
0x1258   :  { %v874_v44 = vpop.permute.xlu0 %873 }
0x1259   :  { %v876_v45 = vmul.f32 %v2556_v62, %v874_v44 }
0x125b   :  { %878 = vrot.lane.b32.xlu1 %v876_v45, %s2617_s3 }
0x12cd   :  { %v879_v47 = vpop.permute.xlu1 %878 }
0x12ce   :  { %v2869_v48 = vadd.f32 %v879_v47, %v871_v46 }
0x12d0   :  { %2557 = vtanh.f32 %v2869_v48 }
0x12da   :  { %v2558_v49 = vpop.eup %2557 }
0x12db   :  { %884 = vrot.lane.b32.xlu0 %v2558_v49, %s2616_s23 }
0x134d   :  { %v885_v56 = vpop.permute.xlu0 %884 }
0x134e   :  { %v887_v57 = vmul.f32 %v2556_v62, %v885_v56 }
0x1350   :  { %889 = vrot.lane.b32.xlu1 %v887_v57, %s2617_s3 }
0x13c2   :  { %v890_v58 = vpop.permute.xlu1 %889 }
0x13c3   :  { %2281 = vmatmul.mubr.msk.f32.vlgmr.msra.gmra.mrb[8].mxu1 %vm182_vm2, %v890_v58  ;;  %2300 = vmatprep.mubr.msk.f32.mxu0 %vm182_vm2, %v890_v58 }
0x13c4   :  { %2460 = vmatpush3.bf16.msra.mxu1 %v2879_v52  ;;  %2311 = vmatprep.mubr.msk.f32.mxu1 %vm2614_vm1, %v2615_v4 }
0x13c5   :  { %2461 = vmatprep.subr.bf16.mxu1 %v2613_v0 }
0x13c8   :  { %2463 = vmatpush3.bf16.msra.mxu1 %v2889_v55 }
0x13c9   :  { %2464 = vmatprep.subr.bf16.mxu1 %v2613_v0 }
0x13cb   :  { %2312 = vmatmul.mubr.f32.vlgmr.msra.gmra.mrb[10].mxu1 %v2615_v4 }
0x13cc   :  { %2466 = vmatpush3.bf16.msra.mxu1 %v2879_v52  ;;  %2322 = vmatprep.mubr.msk.f32.mxu1 %vm2614_vm1, %v2615_v4 }
0x13cd   :  { %2467 = vmatprep.subr.bf16.mxu1 %v2613_v0 }
0x13d0   :  { %2469 = vmatpush3.bf16.msra.mxu1 %v2889_v55 }
0x13d1   :  { %2476 = vmatprep.subr.bf16.mxu1 %v2613_v0 }
0x1496   :  { %v959_v1 = vpop.f32.mrb[8].mxu1 }
0x1497   :  { %v963_v2 = vadd.f32 %v959_v1, %v179_v60  ;;  %v2282_v3 = vpop.f32.mrb[9].mxu1 }
0x1499   :  { %v2039_v10 = vmul.f32 -1.442695, %v963_v2 }
0x149e   :  { %v1180_v8 = vpop.f32.mrb[10].mxu1 }
0x149f   :  { %v1184_v9 = vadd.f32 %v1180_v8, %v1076_v7  ;;  %v2313_v11 = vpop.f32.mrb[11].mxu1  ;;  %v1086_v7 = vadd.f32 %v2914_v6, %v2861_v23 }
0x14a1   :  { %v2050_v13 = vmul.f32 -1.442695, %v1184_v9 }
0x14a3   :  { %2559 = vpow2.f32 %v2050_v13 }
0x14ad   :  { %v2560_v14 = vpop.eup %2559 }
0x14ae   :  { %v1188_v5 = vadd.f32 1.0, %v2560_v14 }
0x14b0   :  { %2561 = vrcp.f32 %v1188_v5 }
0x14b1   :  { %2563 = vpow2.f32 %v2039_v10 }
0x14ba   :  { %v2562_v15 = vpop.eup %2561 }
0x14bb   :  { %v1191_v12 = vmul.f32 2.0, %v2562_v15  ;;  %v2564_v18 = vpop.eup %2563  ;;  %v1193_v59 = vmul.f32 0.0, %v2562_v15 }
0x14bc   :  { %v967_v19 = vadd.f32 1.0, %v2564_v18 }
0x14bd   :  { %v2051_v61 = vadd.f32 -1.0, %v1191_v12 }
0x14be   :  { %2565 = vrcp.f32 %v967_v19 }
0x14bf   :  { %1195 = vrot.lane.b32.xlu0 %v2051_v61, %s2616_s23 }
0x14c8   :  { %v2566_v22 = vpop.eup %2565 }
0x14c9   :  { %v970_v24 = vmul.f32 2.0, %v2566_v22  ;;  %v972_v31 = vmul.f32 %v2566_v22, %v2869_v48 }
0x14cb   :  { %v2040_v26 = vadd.f32 -1.0, %v970_v24 }
0x1531   :  { %v1196_v16 = vpop.permute.xlu0 %1195 }
0x1532   :  { %v1198_v17 = vmul.f32 %v2562_v15, %v1196_v16 }
0x1534   :  { %1200 = vrot.lane.b32.xlu1 %v1198_v17, %s2617_s3 }
0x15a6   :  { %v1201_v20 = vpop.permute.xlu1 %1200 }
0x15a7   :  { %v1203_v21 = vadd.f32 %v1201_v20, %v1193_v59 }
0x15a9   :  { %2567 = vtanh.f32 %v1203_v21 }
0x15b3   :  { %v2568_v25 = vpop.eup %2567 }
0x15b4   :  { %1206 = vrot.lane.b32.xlu0 %v2568_v25, %s2616_s23 }
0x15b8   :  { %974 = vrot.lane.b32.xlu0 %v2040_v26, %s2616_s23 }
0x1626   :  { %v1207_v27 = vpop.permute.xlu0 %1206 }
0x1627   :  { %v1209_v28 = vmul.f32 %v2562_v15, %v1207_v27 }
0x1629   :  { %1211 = vrot.lane.b32.xlu1 %v1209_v28, %s2617_s3 }
0x162a   :  { %v975_v29 = vpop.permute.xlu0 %974 }
0x162b   :  { %v977_v30 = vmul.f32 %v2566_v22, %v975_v29 }
0x162d   :  { %979 = vrot.lane.b32.xlu0 %v977_v30, %s2617_s3 }
0x169b   :  { %v1212_v32 = vpop.permute.xlu1 %1211 }
0x169c   :  { %2323 = vmatmul.mubr.msk.f32.vlgmr.msra.gmra.mrb[12].mxu1 %vm182_vm2, %v1212_v32 }
0x169d   :  { %2478 = vmatpush3.bf16.msra.mxu1 %v2879_v52  ;;  %2344 = vmatprep.mubr.msk.f32.mxu1 %vm2614_vm1, %v2615_v4 }
0x169e   :  { %2479 = vmatprep.subr.bf16.mxu1 %v2613_v0 }
0x169f   :  { %v980_v33 = vpop.permute.xlu0 %979 }
0x16a0   :  { %v982_v34 = vadd.f32 %v980_v33, %v972_v31 }
0x16a1   :  { %2481 = vmatpush3.bf16.msra.mxu1 %v2889_v55 }
0x16a2   :  { %2569 = vtanh.f32 %v982_v34  ;;  %2488 = vmatprep.subr.bf16.mxu1 %v2613_v0 }
0x16ac   :  { %v2570_v35 = vpop.eup %2569 }
0x16ad   :  { %985 = vrot.lane.b32.xlu0 %v2570_v35, %s2616_s23 }
0x171f   :  { %v986_v63 = vpop.permute.xlu0 %985 }
0x1720   :  { %v988_v38 = vmul.f32 %v2566_v22, %v986_v63  ;;  %v1091_v22 = vadd.f32 %v2859_v37, %v2914_v6 }
0x1722   :  { %1005 = vrot.lane.b32.xlu0 %v988_v38, %s2617_s3 }
0x176f   :  { %v1281_v62 = vpop.f32.mrb[12].mxu1 }
0x1770   :  { %v1285_v42 = vadd.f32 %v1281_v62, %v1081_v39  ;;  %v2324_v43 = vpop.f32.mrb[13].mxu1 }
0x1771   :  { %v1096_v43 = vadd.f32 %v2914_v6, %v2865_v41 }
0x1772   :  { %v2053_v44 = vmul.f32 -1.442695, %v1285_v42 }
0x1774   :  { %2571 = vpow2.f32 %v2053_v44 }
0x177e   :  { %v2572_v45 = vpop.eup %2571 }
0x177f   :  { %v1289_v46 = vadd.f32 1.0, %v2572_v45 }
0x1781   :  { %2573 = vrcp.f32 %v1289_v46 }
0x178b   :  { %v2574_v47 = vpop.eup %2573 }
0x178c   :  { %v1292_v48 = vmul.f32 2.0, %v2574_v47  ;;  %v1294_v56 = vmul.f32 %v2574_v47, %v1203_v21 }
0x178e   :  { %v2054_v49 = vadd.f32 -1.0, %v1292_v48 }
0x1790   :  { %1296 = vrot.lane.b32.xlu1 %v2054_v49, %s2616_s23 }
0x1794   :  { %v1006_v50 = vpop.permute.xlu0 %1005 }
0x1795   :  { %2301 = vmatmul.mubr.msk.f32.gmra.mrb[20].mxu0 %vm182_vm2, %v1006_v50 }
0x1796   :  { %2333 = vmatprep.mubr.msk.f32.mxu0 %vm2614_vm1, %v2615_v4 }
0x1802   :  { %v1297_v36 = vpop.permute.xlu1 %1296 }
0x1803   :  { %v1299_v51 = vmul.f32 %v2574_v47, %v1297_v36 }
0x1805   :  { %1301 = vrot.lane.b32.xlu1 %v1299_v51, %s2617_s3 }
0x1868   :  { %v2940_v53 = vpop.f32.mrb[20].mxu0 }
0x1869   :  { %v2942_v54 = vpop.f32.mrb[21].mxu0 }
0x1877   :  { %v1302_v57 = vpop.permute.xlu1 %1301 }
0x1878   :  { %v1304_v58 = vadd.f32 %v1302_v57, %v1294_v56 }
0x187a   :  { %2575 = vtanh.f32 %v1304_v58 }
0x1884   :  { %v2576_v60 = vpop.eup %2575 }
0x1885   :  { %1307 = vrot.lane.b32.xlu1 %v2576_v60, %s2616_s23 }
0x18f7   :  { %v1308_v1 = vpop.permute.xlu1 %1307 }
0x18f8   :  { %v1310_v2 = vmul.f32 %v2574_v47, %v1308_v1 }
0x18fa   :  { %1312 = vrot.lane.b32.xlu1 %v1310_v2, %s2617_s3 }
0x196c   :  { %v1313_v3 = vpop.permute.xlu1 %1312 }
0x196d   :  { %2334 = vmatmul.mubr.msk.f32.vlgmr.msra.gmra.mrb[22].mxu0 %vm182_vm2, %v1313_v3 }
0x196e   :  { %2484 = vmatpush3.bf16.msra.mxu0 %v2879_v52  ;;  %2355 = vmatprep.mubr.msk.f32.mxu0 %vm2614_vm1, %v2615_v4 }
0x196f   :  { %2485 = vmatprep.subr.bf16.mxu0 %v2613_v0 }
0x1972   :  { %2487 = vmatpush3.bf16.msra.mxu0 %v2889_v55 }
0x1973   :  { %2494 = vmatprep.subr.bf16.mxu0 %v2613_v0 }
0x1a40   :  { %v1382_v8 = vpop.f32.mrb[22].mxu0 }
0x1a41   :  { %v1386_v9 = vadd.f32 %v1382_v8, %v1086_v7  ;;  %v2335_v11 = vpop.f32.mrb[23].mxu0  ;;  %v1101_v8 = vadd.f32 %v2863_v40, %v2914_v6 }
0x1a43   :  { %v2056_v13 = vmul.f32 -1.442695, %v1386_v9 }
0x1a45   :  { %2577 = vpow2.f32 %v2056_v13 }
0x1a4f   :  { %v2578_v14 = vpop.eup %2577 }
0x1a50   :  { %v1390_v5 = vadd.f32 1.0, %v2578_v14 }
0x1a52   :  { %2579 = vrcp.f32 %v1390_v5 }
0x1a5c   :  { %v2580_v15 = vpop.eup %2579 }
0x1a5d   :  { %v1393_v12 = vmul.f32 2.0, %v2580_v15  ;;  %v1395_v10 = vmul.f32 %v2580_v15, %v1304_v58 }
0x1a5f   :  { %v2057_v61 = vadd.f32 -1.0, %v1393_v12 }
0x1a61   :  { %1397 = vrot.lane.b32.xlu0 %v2057_v61, %s2616_s23 }
0x1ad3   :  { %v1398_v16 = vpop.permute.xlu0 %1397 }
0x1ad4   :  { %v1400_v17 = vmul.f32 %v2580_v15, %v1398_v16 }
0x1ad6   :  { %1402 = vrot.lane.b32.xlu1 %v1400_v17, %s2617_s3 }
0x1b48   :  { %v1403_v18 = vpop.permute.xlu1 %1402 }
0x1b49   :  { %v1405_v23 = vadd.f32 %v1403_v18, %v1395_v10 }
0x1b4b   :  { %2581 = vtanh.f32 %v1405_v23 }
0x1b55   :  { %v2582_v19 = vpop.eup %2581 }
0x1b56   :  { %1408 = vrot.lane.b32.xlu0 %v2582_v19, %s2616_s23 }
0x1bc8   :  { %v1409_v59 = vpop.permute.xlu0 %1408 }
0x1bc9   :  { %v1411_v20 = vmul.f32 %v2580_v15, %v1409_v59 }
0x1bcb   :  { %1413 = vrot.lane.b32.xlu1 %v1411_v20, %s2617_s3  ;;  %v1106_v20 = vadd.f32 %v2914_v6, %v2942_v54 }
0x1c3d   :  { %v1414_v21 = vpop.permute.xlu1 %1413 }
0x1c3e   :  { %2345 = vmatmul.mubr.msk.f32.vlgmr.msra.gmra.mrb[14].mxu1 %vm182_vm2, %v1414_v21 }
0x1c3f   :  { %2490 = vmatpush3.bf16.msra.mxu1 %v2879_v52  ;;  %2366 = vmatprep.mubr.msk.f32.mxu1 %vm2614_vm1, %v2615_v4 }
0x1c40   :  { %2491 = vmatprep.subr.bf16.mxu1 %v2613_v0 }
0x1c43   :  { %2493 = vmatpush3.bf16.msra.mxu1 %v2889_v55 }
0x1c44   :  { %2500 = vmatprep.subr.bf16.mxu1 %v2613_v0 }
0x1d11   :  { %v1483_v24 = vpop.f32.mrb[14].mxu1 }
0x1d12   :  { %v1487_v25 = vadd.f32 %v1483_v24, %v1091_v22  ;;  %v2346_v26 = vpop.f32.mrb[15].mxu1 }
0x1d14   :  { %v2059_v27 = vmul.f32 -1.442695, %v1487_v25 }
0x1d16   :  { %2583 = vpow2.f32 %v2059_v27 }
0x1d20   :  { %v2584_v28 = vpop.eup %2583 }
0x1d21   :  { %v1491_v29 = vadd.f32 1.0, %v2584_v28 }
0x1d23   :  { %2585 = vrcp.f32 %v1491_v29 }
0x1d2d   :  { %v2586_v30 = vpop.eup %2585 }
0x1d2e   :  { %v1494_v32 = vmul.f32 2.0, %v2586_v30  ;;  %v1496_v35 = vmul.f32 %v2586_v30, %v1405_v23 }
0x1d30   :  { %v2060_v31 = vadd.f32 -1.0, %v1494_v32 }
0x1d32   :  { %1498 = vrot.lane.b32.xlu0 %v2060_v31, %s2616_s23 }
0x1da4   :  { %v1499_v33 = vpop.permute.xlu0 %1498 }
0x1da5   :  { %v1501_v34 = vmul.f32 %v2586_v30, %v1499_v33 }
0x1da7   :  { %1503 = vrot.lane.b32.xlu1 %v1501_v34, %s2617_s3 }
0x1e19   :  { %v1504_v63 = vpop.permute.xlu1 %1503 }
0x1e1a   :  { %v1506_v37 = vadd.f32 %v1504_v63, %v1496_v35 }
0x1e1c   :  { %2587 = vtanh.f32 %v1506_v37 }
0x1e26   :  { %v2588_v38 = vpop.eup %2587 }
0x1e27   :  { %1509 = vrot.lane.b32.xlu0 %v2588_v38, %s2616_s23  ;;  %v1111_v38 = vadd.f32 %v2940_v53, %v2914_v6  ;;  %v1917_v53 = vld [vmem:[%s3040_s7] sm:$0xff] }
0x1e99   :  { %v1510_v39 = vpop.permute.xlu0 %1509 }
0x1e9a   :  { %v1512_v62 = vmul.f32 %v2586_v30, %v1510_v39 }
0x1e9c   :  { %1514 = vrot.lane.b32.xlu1 %v1512_v62, %s2617_s3 }
0x1f0e   :  { %v1515_v42 = vpop.permute.xlu1 %1514 }
0x1f0f   :  { %2356 = vmatmul.mubr.msk.f32.vlgmr.msra.gmra.mrb[24].mxu0 %vm182_vm2, %v1515_v42 }
0x1f10   :  { %2496 = vmatpush3.bf16.msra.mxu0 %v2879_v52  ;;  %2377 = vmatprep.mubr.msk.f32.mxu0 %vm2614_vm1, %v2615_v4 }
0x1f11   :  { %2497 = vmatprep.subr.bf16.mxu0 %v2613_v0 }
0x1f14   :  { %2499 = vmatpush3.bf16.msra.mxu0 %v2889_v55 }
0x1f15   :  { %2506 = vmatprep.subr.bf16.mxu0 %v2613_v0 }
0x1fe2   :  { %v1584_v44 = vpop.f32.mrb[24].mxu0 }
0x1fe3   :  { %v1588_v45 = vadd.f32 %v1584_v44, %v1096_v43  ;;  %v2357_v46 = vpop.f32.mrb[25].mxu0 }
0x1fe5   :  { %v2062_v47 = vmul.f32 -1.442695, %v1588_v45 }
0x1fe7   :  { %2589 = vpow2.f32 %v2062_v47 }
0x1ff1   :  { %v2590_v48 = vpop.eup %2589 }
0x1ff2   :  { %v1592_v49 = vadd.f32 1.0, %v2590_v48 }
0x1ff4   :  { %2591 = vrcp.f32 %v1592_v49 }
0x1ffe   :  { %v2592_v50 = vpop.eup %2591 }
0x1fff   :  { %v1595_v36 = vmul.f32 2.0, %v2592_v50  ;;  %v1597_v58 = vmul.f32 %v2592_v50, %v1506_v37 }
0x2001   :  { %v2063_v51 = vadd.f32 -1.0, %v1595_v36 }
0x2003   :  { %1599 = vrot.lane.b32.xlu0 %v2063_v51, %s2616_s23 }
0x2075   :  { %v1600_v56 = vpop.permute.xlu0 %1599 }
0x2076   :  { %v1602_v57 = vmul.f32 %v2592_v50, %v1600_v56  ;;  %v1918_v56 = vld [vmem:[%s3040_s7 + $0x8] sm:$0xff] }
0x2078   :  { %1604 = vrot.lane.b32.xlu1 %v1602_v57, %s2617_s3  ;;  %v1919_v57 = vld [vmem:[%s3040_s7 + $0x10] sm:$0xff] }
0x20ea   :  { %v1605_v60 = vpop.permute.xlu1 %1604 }
0x20eb   :  { %v1607_v41 = vadd.f32 %v1605_v60, %v1597_v58  ;;  %v2507_v58 = vpack.c.bf16 %v1918_v56, %v1917_v53  ;;  %v1920_v60 = vld [vmem:[%s3040_s7 + $0x18] sm:$0xff] }
0x20ed   :  { %2593 = vtanh.f32 %v1607_v41 }
0x20f7   :  { %v2594_v1 = vpop.eup %2593 }
0x20f8   :  { %1610 = vrot.lane.b32.xlu0 %v2594_v1, %s2616_s23 }
0x216a   :  { %v1611_v2 = vpop.permute.xlu0 %1610 }
0x216b   :  { %v1613_v3 = vmul.f32 %v2592_v50, %v1611_v2 }
0x216d   :  { %1615 = vrot.lane.b32.xlu1 %v1613_v3, %s2617_s3 }
0x21df   :  { %v1616_v7 = vpop.permute.xlu1 %1615 }
0x21e0   :  { %2367 = vmatmul.mubr.msk.f32.vlgmr.msra.gmra.mrb[16].mxu1 %vm182_vm2, %v1616_v7 }
0x21e1   :  { %2502 = vmatpush3.bf16.msra.mxu1 %v2879_v52  ;;  %2388 = vmatprep.mubr.msk.f32.mxu1 %vm2614_vm1, %v2615_v4 }
0x21e2   :  { %2503 = vmatprep.subr.bf16.mxu1 %v2613_v0 }
0x21e5   :  { %2505 = vmatpush3.bf16.msra.mxu1 %v2889_v55 }
0x22b3   :  { %v1685_v9 = vpop.f32.mrb[16].mxu1 }
0x22b4   :  { %v1689_v11 = vadd.f32 %v1685_v9, %v1101_v8  ;;  %v2368_v13 = vpop.f32.mrb[17].mxu1  ;;  %v2073_v8 = vld [vmem:[%s3041_s8] ss:$0 sm:$0xff] }
0x22b6   :  { %v2065_v14 = vmul.f32 -1.442695, %v1689_v11 }
0x22b8   :  { %2595 = vpow2.f32 %v2065_v14 }
0x22c2   :  { %v2596_v5 = vpop.eup %2595 }
0x22c3   :  { %v1693_v15 = vadd.f32 1.0, %v2596_v5 }
0x22c5   :  { %2597 = vrcp.f32 %v1693_v15 }
0x22cf   :  { %v2598_v12 = vpop.eup %2597 }
0x22d0   :  { %v1696_v52 = vmul.f32 2.0, %v2598_v12  ;;  %v1698_v55 = vmul.f32 %v2598_v12, %v1607_v41  ;;  %v2510_v41 = vpack.c.bf16 %v1920_v60, %v1919_v57 }
0x22d2   :  { %v2066_v61 = vadd.f32 -1.0, %v1696_v52 }
0x22d4   :  { %1700 = vrot.lane.b32.xlu0 %v2066_v61, %s2616_s23 }
0x2346   :  { %v1701_v16 = vpop.permute.xlu0 %1700 }
0x2347   :  { %v1703_v17 = vmul.f32 %v2598_v12, %v1701_v16 }
0x2349   :  { %1705 = vrot.lane.b32.xlu1 %v1703_v17, %s2617_s3 }
0x23bb   :  { %v1706_v10 = vpop.permute.xlu1 %1705 }
0x23bc   :  { %v1708_v40 = vadd.f32 %v1706_v10, %v1698_v55 }
0x23be   :  { %2599 = vtanh.f32 %v1708_v40 }
0x23c8   :  { %v2600_v18 = vpop.eup %2599 }
0x23c9   :  { %1711 = vrot.lane.b32.xlu0 %v2600_v18, %s2616_s23 }
0x243b   :  { %v1712_v23 = vpop.permute.xlu0 %1711 }
0x243c   :  { %v1714_v19 = vmul.f32 %v2598_v12, %v1712_v23 }
0x243e   :  { %1716 = vrot.lane.b32.xlu1 %v1714_v19, %s2617_s3 }
0x24b0   :  { %v1717_v59 = vpop.permute.xlu1 %1716 }
0x24b1   :  { %2378 = vmatmul.mubr.msk.f32.vlgmr.msra.gmra.mrb[26].mxu0 %vm182_vm2, %v1717_v59 }
0x24b2   :  { %2399 = vmatprep.mubr.msk.f32.mxu0 %vm2614_vm1, %v2615_v4  ;;  %2508 = vmatpush3.bf16.msra.mxu0 %v2507_v58 }
0x24b3   :  { %2509 = vmatprep.subr.bf16.mxu0 %v2613_v0 }
0x24b6   :  { %2511 = vmatpush3.bf16.msra.mxu0 %v2510_v41 }
0x2584   :  { %v1786_v21 = vpop.f32.mrb[26].mxu0 }
0x2585   :  { %v1790_v22 = vadd.f32 %v1786_v21, %v1106_v20  ;;  %v2379_v24 = vpop.f32.mrb[27].mxu0 }
0x2587   :  { %v2068_v25 = vmul.f32 -1.442695, %v1790_v22 }
0x2589   :  { %2601 = vpow2.f32 %v2068_v25 }
0x2593   :  { %v2602_v26 = vpop.eup %2601 }
0x2594   :  { %v1794_v27 = vadd.f32 1.0, %v2602_v26 }
0x2596   :  { %2603 = vrcp.f32 %v1794_v27 }
0x25a0   :  { %v2604_v28 = vpop.eup %2603 }
0x25a1   :  { %v1797_v29 = vmul.f32 2.0, %v2604_v28  ;;  %v1799_v4 = vmul.f32 %v2604_v28, %v1708_v40 }
0x25a3   :  { %v2069_v30 = vadd.f32 -1.0, %v1797_v29 }
0x25a5   :  { %1801 = vrot.lane.b32.xlu0 %v2069_v30, %s2616_s23 }
0x2617   :  { %v1802_v32 = vpop.permute.xlu0 %1801 }
0x2618   :  { %v1804_v31 = vmul.f32 %v2604_v28, %v1802_v32 }
0x261a   :  { %1806 = vrot.lane.b32.xlu1 %v1804_v31, %s2617_s3 }
0x268c   :  { %v1807_v33 = vpop.permute.xlu1 %1806 }
0x268d   :  { %v1809_v54 = vadd.f32 %v1807_v33, %v1799_v4 }
0x268f   :  { %2605 = vtanh.f32 %v1809_v54 }
0x2699   :  { %v2606_v34 = vpop.eup %2605 }
0x269a   :  { %1812 = vrot.lane.b32.xlu0 %v2606_v34, %s2616_s23 }
0x270c   :  { %v1813_v35 = vpop.permute.xlu0 %1812 }
0x270d   :  { %v1815_v63 = vmul.f32 %v2604_v28, %v1813_v35 }
0x270f   :  { %1817 = vrot.lane.b32.xlu1 %v1815_v63, %s2617_s3 }
0x2781   :  { %v1818_v37 = vpop.permute.xlu1 %1817 }
0x2782   :  { %2389 = vmatmul.mubr.msk.f32.vlgmr.msra.gmra.mrb[18].mxu1 %vm182_vm2, %v1818_v37 }
0x2855   :  { %v1887_v39 = vpop.f32.mrb[18].mxu1 }
0x2856   :  { %v1891_v62 = vadd.f32 %v1887_v39, %v1111_v38  ;;  %v2390_v42 = vpop.f32.mrb[19].mxu1 }
0x2858   :  { %v2071_v43 = vmul.f32 -1.442695, %v1891_v62 }
0x285a   :  { %2607 = vpow2.f32 %v2071_v43 }
0x2864   :  { %v2608_v44 = vpop.eup %2607 }
0x2865   :  { %v1895_v45 = vadd.f32 1.0, %v2608_v44 }
0x2867   :  { %2609 = vrcp.f32 %v1895_v45 }
0x2871   :  { %v2610_v46 = vpop.eup %2609 }
0x2872   :  { %v1898_v47 = vmul.f32 2.0, %v2610_v46  ;;  %v1900_v36 = vmul.f32 %v2610_v46, %v1809_v54 }
0x2874   :  { %v2072_v48 = vadd.f32 -1.0, %v1898_v47 }
0x2876   :  { %1902 = vrot.lane.b32.xlu0 %v2072_v48, %s2616_s23 }
0x28e8   :  { %v1903_v49 = vpop.permute.xlu0 %1902 }
0x28e9   :  { %v1905_v50 = vmul.f32 %v2610_v46, %v1903_v49 }
0x28eb   :  { %1907 = vrot.lane.b32.xlu1 %v1905_v50, %s2617_s3 }
0x295d   :  { %v1908_v51 = vpop.permute.xlu1 %1907 }
0x295e   :  { %v1910_v6 = vadd.f32 %v1908_v51, %v1900_v36 }
0x2960   :  { %2611 = vtanh.f32 %v1910_v6 }
0x296a   :  { %v2612_v1 = vpop.eup %2611 }
0x296b   :  { %1913 = vrot.lane.b32.xlu0 %v2612_v1, %s2616_s23 }
0x29dd   :  { %v1914_v2 = vpop.permute.xlu0 %1913 }
0x29de   :  { %v1916_v3 = vmul.f32 %v2610_v46, %v1914_v2 }
0x29e0   :  { %1929 = vrot.lane.b32.xlu1 %v1916_v3, %s2617_s3 }
0x2a52   :  { %v1930_v7 = vpop.permute.xlu1 %1929 }
0x2a53   :  { %2400 = vmatmul.mubr.msk.f32.vlgmr.msra.gmra.mrb[28].mxu0 %vm182_vm2, %v1930_v7 }
0x2b26   :  { %v1999_v9 = vpop.f32.mrb[28].mxu0 }
0x2b27   :  { %v2000_v11 = vadd.f32 %v2073_v8, %v1999_v9  ;;  %v2401_v13 = vpop.f32.mrb[29].mxu0 }
0x2b29   :  { %2004 = vst.msk [vmem:[%s3042_s9] sm:$0xff] %vm2003_vm3, %v2000_v11 }

</bundles_post_ra>
